<compile_context>
chip_gen: v6e
topology: v6e:2x2x1
jax: 0.10.0
libtpu: 0.0.40
codegen_flags: <defaults>
</compile_context>

<pallas_src>
import numpy as np
import jax
import jax.numpy as jnp
from jax.experimental import pallas as pl
from jax.experimental.pallas import tpu as pltpu


# ---------------------------------------------------------------------------
# Spectral (per-mode complex) matmul kernel
# ---------------------------------------------------------------------------
def _spectral_kernel(xr_ref, xi_ref, ks_ref, yr_ref, yi_ref):
    """Block of TM retained Fourier modes.

    xr/xi : (B, TM, C)   real/imag FFT coefficients (no host-side transpose).
    ks    : (TM, C, 2C)  per-mode stacked, pre-transposed kernel [K_r^T | K_i^T].
    yr/yi : (B, TM, C)   real/imag of y = K @ x.

    One MXU push per mode: [xr; xi] (2B, C) @ [K_r^T | K_i^T] (C, 2C) yields all
    four partial products; two VPU add/subs recombine them into yr / yi.
    """
    B, TM, C = xr_ref.shape
    x = jnp.concatenate([xr_ref[...], xi_ref[...]], axis=0)      # (2B, TM, C)
    for m in range(TM):                                          # static unroll
        p = jnp.dot(x[:, m, :], ks_ref[m],
                    preferred_element_type=jnp.float32)          # (2B, 2C)
        yr_ref[:, m, :] = p[:B, :C] - p[B:, C:]
        yi_ref[:, m, :] = p[:B, C:] + p[B:, :C]


def _pick_mode_tile(M, C):
    # One K block is TM*C*(2C)*4 bytes and gets double-buffered; keep it small
    # enough (<= 4 MiB) to fit comfortably even under the v7x scoped-VMEM limit.
    budget = 4 * 1024 * 1024
    for tm in (32, 24, 16, 8):
        if M % tm == 0 and tm * C * (2 * C) * 4 <= budget:
            return tm
    return M  # tiny / odd M: single full-extent block (still layout-legal)


def spectral_matmul(xr, xi, k_stacked):
    """xr/xi: (B, M, C) retained modes; k_stacked: (M, C, 2C) = [K_r^T | K_i^T]."""
    B, M, C = xr.shape
    TM = _pick_mode_tile(M, C)
    grid = M // TM
    x_spec = pl.BlockSpec((B, TM, C), lambda m: (0, m, 0))
    k_spec = pl.BlockSpec((TM, C, 2 * C), lambda m: (m, 0, 0))
    return pl.pallas_call(
        _spectral_kernel,
        out_shape=(jax.ShapeDtypeStruct((B, M, C), jnp.float32),
                   jax.ShapeDtypeStruct((B, M, C), jnp.float32)),
        grid=(grid,),
        in_specs=[x_spec, x_spec, k_spec],
        out_specs=(x_spec, x_spec),
        compiler_params=pltpu.CompilerParams(
            dimension_semantics=("parallel",)),
    )(xr, xi, k_stacked)


# ---------------------------------------------------------------------------
# Residual (linear + skip) kernel
# ---------------------------------------------------------------------------
def _make_residual_kernel(linear_connection, skip_connection):
    def kernel(*refs):
        if linear_connection:
            ifft_ref, x_ref, wt_ref, o_ref = refs
        else:
            ifft_ref, x_ref, o_ref = refs
        acc = ifft_ref[...]
        if linear_connection:
            acc = acc + jnp.dot(x_ref[...], wt_ref[...],
                                preferred_element_type=jnp.float32)
        if skip_connection:
            acc = acc + x_ref[...]
        o_ref[...] = acc
    return kernel


def _pick_row_tile(N, C):
    # HBM-bandwidth-bound stage: biggest multiple-of-8 row tile (<= ~2048) that
    # divides N while keeping each block <= ~2 MiB (VMEM headroom on v7x).
    cap = min(2048, max(8, (2 * 1024 * 1024) // (4 * max(C, 1))))
    start = (min(N, cap) // 8) * 8
    for d in range(start, 0, -8):
        if N % d == 0:
            return d
    return N  # no multiple-of-8 divisor: single full-extent block


def residual_add(ifft_flat, x_flat, w_t, linear_connection, skip_connection):
    """out = ifft + (x @ W^T if linear) + (x if skip); flat layout (N, C)."""
    # TODO(synk): for C < 32 a fused XLA elementwise+matmul is likely faster and
    # lane-dense; kept in Pallas here to exercise the kernel path.
    N, C = ifft_flat.shape
    tile = _pick_row_tile(N, C)
    row_spec = pl.BlockSpec((tile, C), lambda i: (i, 0))
    if linear_connection:
        w_spec = pl.BlockSpec((C, C), lambda i: (0, 0))
        in_specs = [row_spec, row_spec, w_spec]
        args = (ifft_flat, x_flat, w_t)
    else:
        in_specs = [row_spec, row_spec]
        args = (ifft_flat, x_flat)
    return pl.pallas_call(
        _make_residual_kernel(linear_connection, skip_connection),
        out_shape=jax.ShapeDtypeStruct((N, C), jnp.float32),
        grid=(N // tile,),
        in_specs=in_specs,
        out_specs=row_spec,
        compiler_params=pltpu.CompilerParams(
            dimension_semantics=("parallel",)),
    )(*args)


# ---------------------------------------------------------------------------
# _FourierLayer equivalent
# ---------------------------------------------------------------------------
class FourierLayerPallas:
    def __init__(self, channels, mode_num, linear_connection=False,
                 skip_connection=False, bias=False, xavier_gain=5.0 / 3.0,
                 space_res=None, key=None):
        if isinstance(mode_num, int):
            mode_num = (mode_num,)
        self.channels = channels
        self.linear_connection = bool(linear_connection)
        self.skip_connection = bool(skip_connection)
        self.mode_num_orig = tuple(mode_num)
        mn = list(mode_num)
        mn[-1] = mn[-1] // 2 + 1
        self.mode_num = tuple(mn)
        self.data_dim = len(mn)
        self.fourier_axes = tuple(range(1, self.data_dim + 1))
        # TODO(synk): BatchNorm1d / LayerNorm branch (space_res != None) not implemented.
        assert space_res is None

        key = jax.random.PRNGKey(0) if key is None else key
        k1, k2, k3 = jax.random.split(key, 3)

        # Deterministic xavier-normal-like init of the complex spectral kernel.
        shape = (*self.mode_num, channels, channels)
        receptive = int(np.prod(shape[2:])) if len(shape) > 2 else 1
        fan_in = shape[1] * receptive
        fan_out = shape[0] * receptive
        std = xavier_gain * np.sqrt(2.0 / (fan_in + fan_out))
        self.kernel_real = (std / np.sqrt(2.0)) * jax.random.normal(
            k1, shape, jnp.float32)
        self.kernel_imag = (std / np.sqrt(2.0)) * jax.random.normal(
            k2, shape, jnp.float32)

        # Pre-transpose + stack the spectral kernel ONCE: (M, C, 2C) = [K_r^T|K_i^T]
        # so the per-call traced graph carries no weight reshuffling.
        M = int(np.prod(self.mode_num))
        self.num_modes = M
        krt = self.kernel_real.reshape(M, channels, channels).transpose(0, 2, 1)
        kit = self.kernel_imag.reshape(M, channels, channels).transpose(0, 2, 1)
        self.k_stacked = jnp.concatenate([krt, kit], axis=-1)    # (M, C, 2C)

        if self.linear_connection:
            bound = 1.0 / np.sqrt(channels)
            self.lin_w = jax.random.uniform(
                k3, (channels, channels), jnp.float32, -bound, bound)
            self.lin_w_t = jnp.asarray(self.lin_w.T)             # pre-transposed
            # TODO(synk): linear bias not wired (demo uses bias=False, the default).
            assert not bias
        else:
            self.lin_w = None
            self.lin_w_t = None

        # Retained-mode indices for every Fourier dim except the last
        # (negative + positive low frequencies, exactly like compute_mode_slice).
        self.mode_idx = [list(range(-(n // 2), 0)) + list(range(0, n // 2 + n % 2))
                         for n in self.mode_num_orig[:-1]]

    def _gather_slice(self, fft_spatial):
        if self.data_dim > 1:
            grids = np.meshgrid(
                *[np.asarray(idx) % fft_spatial[d]
                  for d, idx in enumerate(self.mode_idx)], indexing="ij")
            idx = tuple(jnp.asarray(g) for g in grids)
            return (slice(None), *idx, slice(0, self.mode_num[-1]), slice(None))
        return (slice(None), slice(0, self.mode_num[-1]), slice(None))

    def __call__(self, points):
        B = points.shape[0]
        C = points.shape[-1]
        spatial = points.shape[1:-1]

        fft = jnp.fft.rfftn(points, axes=self.fourier_axes, norm="forward")
        fft_spatial = fft.shape[1:-1]
        # TODO(synk): zero-padding path for under-resolved inputs
        # (fft resolution < mode_num) not implemented; demo shapes never hit it.
        assert all(s >= m for s, m in zip(fft_spatial, self.mode_num))

        slc = self._gather_slice(fft_spatial)
        fft_sel = fft[slc]                      # (B, *mode_num, C) complex64
        mode_shape = fft_sel.shape[1:-1]
        M = int(np.prod(mode_shape))

        # Keep the natural (B, M, C) layout — no activation transposes.
        xr = jnp.real(fft_sel).reshape(B, M, C).astype(jnp.float32)
        xi = jnp.imag(fft_sel).reshape(B, M, C).astype(jnp.float32)

        yr, yi = spectral_matmul(xr, xi, self.k_stacked)
        y = (yr + 1j * yi).astype(fft.dtype).reshape(B, *mode_shape, C)

        out_f = jnp.zeros_like(fft).at[slc].set(y)
        ifft = jnp.fft.irfftn(out_f, s=spatial, axes=self.fourier_axes,
                              norm="forward").astype(jnp.float32)

        if self.linear_connection or self.skip_connection:
            N = B * int(np.prod(spatial))
            ifft_flat = ifft.reshape(N, C)
            x_flat = points.reshape(N, C).astype(jnp.float32)
            out = residual_add(ifft_flat, x_flat, self.lin_w_t,
                               self.linear_connection, self.skip_connection)
            return out.reshape(B, *spatial, C)
        return ifft


# ---------------------------------------------------------------------------
# Pure-JAX reference (mirrors the PyTorch forward) for verification
# ---------------------------------------------------------------------------
def reference_forward(layer, points):
    spatial = points.shape[1:-1]
    fft = jnp.fft.rfftn(points, axes=layer.fourier_axes, norm="forward")
    slc = layer._gather_slice(fft.shape[1:-1])
    fft_sel = fft[slc]
    K = (layer.kernel_real + 1j * layer.kernel_imag).astype(fft.dtype)
    y = jnp.einsum("...ij,b...j->b...i", K, fft_sel)
    out_f = jnp.zeros_like(fft).at[slc].set(y)
    ifft = jnp.fft.irfftn(out_f, s=spatial, axes=layer.fourier_axes,
                          norm="forward").astype(jnp.float32)
    if layer.linear_connection:
        ifft = ifft + points @ layer.lin_w.T
    if layer.skip_connection:
        ifft = ifft + points
    return ifft


if __name__ == "__main__":
    B, H, W, C = 2, 16, 16, 4           # small demo shapes
    x = jax.random.normal(jax.random.PRNGKey(0), (B, H, W, C), jnp.float32)

    layer = FourierLayerPallas(channels=C, mode_num=(8, 8),
                               linear_connection=True, skip_connection=True,
                               bias=False, key=jax.random.PRNGKey(1))

    out = jax.jit(layer.__call__)(x)
    out = jax.block_until_ready(out)

    ref = reference_forward(layer, x)
    assert out.shape == (B, H, W, C)
    np.testing.assert_allclose(np.asarray(out), np.asarray(ref),
                               rtol=1e-4, atol=1e-4)
    print("KERNEL_OK")
</pallas_src>

<mosaic_0001>
module attributes {stable_mosaic.version = 11 : i64} {
  func.func @_spectral_kernel(%arg0: i32, %arg1: memref<2x8x4xf32, #tpu.memory_space<vmem>>, %arg2: memref<2x8x4xf32, #tpu.memory_space<vmem>>, %arg3: memref<8x4x8xf32, #tpu.memory_space<vmem>>, %arg4: memref<2x8x4xf32, #tpu.memory_space<vmem>>, %arg5: memref<2x8x4xf32, #tpu.memory_space<vmem>>) attributes {dimension_semantics = [#tpu.dimension_semantics<parallel>], iteration_bounds = array<i64: 5>, scalar_prefetch = 0 : i64, scratch_operands = 0 : i64, tpu.core_type = #tpu.core_type<tc>, window_params = [{transform_indices = @transform_0, window_bounds = array<i64: 2, 8, 4>}, {transform_indices = @transform_1, window_bounds = array<i64: 2, 8, 4>}, {transform_indices = @transform_2, window_bounds = array<i64: 8, 4, 8>}, {transform_indices = @transform_3, window_bounds = array<i64: 2, 8, 4>}, {transform_indices = @transform_4, window_bounds = array<i64: 2, 8, 4>}]} {
    %c0 = arith.constant 0 : index
    %c0_0 = arith.constant 0 : index
    %c0_1 = arith.constant 0 : index
    %0 = vector.load %arg1[%c0, %c0_0, %c0_1] : memref<2x8x4xf32, #tpu.memory_space<vmem>>, vector<2x8x4xf32>
    %c0_2 = arith.constant 0 : index
    %c0_3 = arith.constant 0 : index
    %c0_4 = arith.constant 0 : index
    %1 = vector.load %arg2[%c0_2, %c0_3, %c0_4] : memref<2x8x4xf32, #tpu.memory_space<vmem>>, vector<2x8x4xf32>
    %2 = tpu.concatenate %0, %1 in 0 : vector<2x8x4xf32>, vector<2x8x4xf32> -> vector<4x8x4xf32>
    %3 = vector.extract_strided_slice %2 {offsets = [0, 0, 0], sizes = [4, 1, 4], strides = [1, 1, 1]} : vector<4x8x4xf32> to vector<4x1x4xf32>
    %4 = vector.shape_cast %3 : vector<4x1x4xf32> to vector<4x4xf32>
    %c0_5 = arith.constant 0 : index
    %c0_6 = arith.constant 0 : index
    %c0_7 = arith.constant 0 : index
    %5 = vector.load %arg3[%c0_5, %c0_6, %c0_7] : memref<8x4x8xf32, #tpu.memory_space<vmem>>, vector<1x4x8xf32>
    %6 = vector.shape_cast %5 : vector<1x4x8xf32> to vector<4x8xf32>
    %cst = arith.constant dense<0.000000e+00> : vector<4x8xf32>
    %7 = tpu.matmul %4, %6, %cst {dimension_numbers = #tpu.dot_dimension_numbers<[1], [0], [0], [1], [0, 0, 1, 1], [], []>} : vector<4x4xf32>, vector<4x8xf32>, vector<4x8xf32> -> vector<4x8xf32>
    %8 = vector.extract_strided_slice %7 {offsets = [0, 0], sizes = [2, 4], strides = [1, 1]} : vector<4x8xf32> to vector<2x4xf32>
    %9 = vector.extract_strided_slice %7 {offsets = [2, 4], sizes = [2, 4], strides = [1, 1]} : vector<4x8xf32> to vector<2x4xf32>
    %10 = arith.subf %8, %9 : vector<2x4xf32>
    %c0_8 = arith.constant 0 : index
    %c0_9 = arith.constant 0 : index
    %c0_10 = arith.constant 0 : index
    %11 = vector.load %arg4[%c0_8, %c0_9, %c0_10] : memref<2x8x4xf32, #tpu.memory_space<vmem>>, vector<2x1x4xf32>
    %12 = vector.shape_cast %11 : vector<2x1x4xf32> to vector<2x4xf32>
    %13 = vector.shape_cast %10 : vector<2x4xf32> to vector<2x1x4xf32>
    tpu.vector_store %arg4[%c0_8, %c0_9, %c0_10], %13 {strides = array<i32>} : memref<2x8x4xf32, #tpu.memory_space<vmem>>, vector<2x1x4xf32>,
    %14 = vector.extract_strided_slice %7 {offsets = [0, 4], sizes = [2, 4], strides = [1, 1]} : vector<4x8xf32> to vector<2x4xf32>
    %15 = vector.extract_strided_slice %7 {offsets = [2, 0], sizes = [2, 4], strides = [1, 1]} : vector<4x8xf32> to vector<2x4xf32>
    %16 = arith.addf %14, %15 : vector<2x4xf32>
    %c0_11 = arith.constant 0 : index
    %c0_12 = arith.constant 0 : index
    %c0_13 = arith.constant 0 : index
    %17 = vector.load %arg5[%c0_11, %c0_12, %c0_13] : memref<2x8x4xf32, #tpu.memory_space<vmem>>, vector<2x1x4xf32>
    %18 = vector.shape_cast %17 : vector<2x1x4xf32> to vector<2x4xf32>
    %19 = vector.shape_cast %16 : vector<2x4xf32> to vector<2x1x4xf32>
    tpu.vector_store %arg5[%c0_11, %c0_12, %c0_13], %19 {strides = array<i32>} : memref<2x8x4xf32, #tpu.memory_space<vmem>>, vector<2x1x4xf32>,
    %20 = vector.extract_strided_slice %2 {offsets = [0, 1, 0], sizes = [4, 1, 4], strides = [1, 1, 1]} : vector<4x8x4xf32> to vector<4x1x4xf32>
    %21 = vector.shape_cast %20 : vector<4x1x4xf32> to vector<4x4xf32>
    %c1 = arith.constant 1 : index
    %c0_14 = arith.constant 0 : index
    %c0_15 = arith.constant 0 : index
    %22 = vector.load %arg3[%c1, %c0_14, %c0_15] : memref<8x4x8xf32, #tpu.memory_space<vmem>>, vector<1x4x8xf32>
    %23 = vector.shape_cast %22 : vector<1x4x8xf32> to vector<4x8xf32>
    %cst_16 = arith.constant dense<0.000000e+00> : vector<4x8xf32>
    %24 = tpu.matmul %21, %23, %cst_16 {dimension_numbers = #tpu.dot_dimension_numbers<[1], [0], [0], [1], [0, 0, 1, 1], [], []>} : vector<4x4xf32>, vector<4x8xf32>, vector<4x8xf32> -> vector<4x8xf32>
    %25 = vector.extract_strided_slice %24 {offsets = [0, 0], sizes = [2, 4], strides = [1, 1]} : vector<4x8xf32> to vector<2x4xf32>
    %26 = vector.extract_strided_slice %24 {offsets = [2, 4], sizes = [2, 4], strides = [1, 1]} : vector<4x8xf32> to vector<2x4xf32>
    %27 = arith.subf %25, %26 : vector<2x4xf32>
    %c0_17 = arith.constant 0 : index
    %c1_18 = arith.constant 1 : index
    %c0_19 = arith.constant 0 : index
    %28 = vector.load %arg4[%c0_17, %c1_18, %c0_19] : memref<2x8x4xf32, #tpu.memory_space<vmem>>, vector<2x1x4xf32>
    %29 = vector.shape_cast %28 : vector<2x1x4xf32> to vector<2x4xf32>
    %30 = vector.shape_cast %27 : vector<2x4xf32> to vector<2x1x4xf32>
    tpu.vector_store %arg4[%c0_17, %c1_18, %c0_19], %30 {strides = array<i32>} : memref<2x8x4xf32, #tpu.memory_space<vmem>>, vector<2x1x4xf32>,
    %31 = vector.extract_strided_slice %24 {offsets = [0, 4], sizes = [2, 4], strides = [1, 1]} : vector<4x8xf32> to vector<2x4xf32>
    %32 = vector.extract_strided_slice %24 {offsets = [2, 0], sizes = [2, 4], strides = [1, 1]} : vector<4x8xf32> to vector<2x4xf32>
    %33 = arith.addf %31, %32 : vector<2x4xf32>
    %c0_20 = arith.constant 0 : index
    %c1_21 = arith.constant 1 : index
    %c0_22 = arith.constant 0 : index
    %34 = vector.load %arg5[%c0_20, %c1_21, %c0_22] : memref<2x8x4xf32, #tpu.memory_space<vmem>>, vector<2x1x4xf32>
    %35 = vector.shape_cast %34 : vector<2x1x4xf32> to vector<2x4xf32>
    %36 = vector.shape_cast %33 : vector<2x4xf32> to vector<2x1x4xf32>
    tpu.vector_store %arg5[%c0_20, %c1_21, %c0_22], %36 {strides = array<i32>} : memref<2x8x4xf32, #tpu.memory_space<vmem>>, vector<2x1x4xf32>,
    %37 = vector.extract_strided_slice %2 {offsets = [0, 2, 0], sizes = [4, 1, 4], strides = [1, 1, 1]} : vector<4x8x4xf32> to vector<4x1x4xf32>
    %38 = vector.shape_cast %37 : vector<4x1x4xf32> to vector<4x4xf32>
    %c2 = arith.constant 2 : index
    %c0_23 = arith.constant 0 : index
    %c0_24 = arith.constant 0 : index
    %39 = vector.load %arg3[%c2, %c0_23, %c0_24] : memref<8x4x8xf32, #tpu.memory_space<vmem>>, vector<1x4x8xf32>
    %40 = vector.shape_cast %39 : vector<1x4x8xf32> to vector<4x8xf32>
    %cst_25 = arith.constant dense<0.000000e+00> : vector<4x8xf32>
    %41 = tpu.matmul %38, %40, %cst_25 {dimension_numbers = #tpu.dot_dimension_numbers<[1], [0], [0], [1], [0, 0, 1, 1], [], []>} : vector<4x4xf32>, vector<4x8xf32>, vector<4x8xf32> -> vector<4x8xf32>
    %42 = vector.extract_strided_slice %41 {offsets = [0, 0], sizes = [2, 4], strides = [1, 1]} : vector<4x8xf32> to vector<2x4xf32>
    %43 = vector.extract_strided_slice %41 {offsets = [2, 4], sizes = [2, 4], strides = [1, 1]} : vector<4x8xf32> to vector<2x4xf32>
    %44 = arith.subf %42, %43 : vector<2x4xf32>
    %c0_26 = arith.constant 0 : index
    %c2_27 = arith.constant 2 : index
    %c0_28 = arith.constant 0 : index
    %45 = vector.load %arg4[%c0_26, %c2_27, %c0_28] : memref<2x8x4xf32, #tpu.memory_space<vmem>>, vector<2x1x4xf32>
    %46 = vector.shape_cast %45 : vector<2x1x4xf32> to vector<2x4xf32>
    %47 = vector.shape_cast %44 : vector<2x4xf32> to vector<2x1x4xf32>
    tpu.vector_store %arg4[%c0_26, %c2_27, %c0_28], %47 {strides = array<i32>} : memref<2x8x4xf32, #tpu.memory_space<vmem>>, vector<2x1x4xf32>,
    %48 = vector.extract_strided_slice %41 {offsets = [0, 4], sizes = [2, 4], strides = [1, 1]} : vector<4x8xf32> to vector<2x4xf32>
    %49 = vector.extract_strided_slice %41 {offsets = [2, 0], sizes = [2, 4], strides = [1, 1]} : vector<4x8xf32> to vector<2x4xf32>
    %50 = arith.addf %48, %49 : vector<2x4xf32>
    %c0_29 = arith.constant 0 : index
    %c2_30 = arith.constant 2 : index
    %c0_31 = arith.constant 0 : index
    %51 = vector.load %arg5[%c0_29, %c2_30, %c0_31] : memref<2x8x4xf32, #tpu.memory_space<vmem>>, vector<2x1x4xf32>
    %52 = vector.shape_cast %51 : vector<2x1x4xf32> to vector<2x4xf32>
    %53 = vector.shape_cast %50 : vector<2x4xf32> to vector<2x1x4xf32>
    tpu.vector_store %arg5[%c0_29, %c2_30, %c0_31], %53 {strides = array<i32>} : memref<2x8x4xf32, #tpu.memory_space<vmem>>, vector<2x1x4xf32>,
    %54 = vector.extract_strided_slice %2 {offsets = [0, 3, 0], sizes = [4, 1, 4], strides = [1, 1, 1]} : vector<4x8x4xf32> to vector<4x1x4xf32>
    %55 = vector.shape_cast %54 : vector<4x1x4xf32> to vector<4x4xf32>
    %c3 = arith.constant 3 : index
    %c0_32 = arith.constant 0 : index
    %c0_33 = arith.constant 0 : index
    %56 = vector.load %arg3[%c3, %c0_32, %c0_33] : memref<8x4x8xf32, #tpu.memory_space<vmem>>, vector<1x4x8xf32>
    %57 = vector.shape_cast %56 : vector<1x4x8xf32> to vector<4x8xf32>
    %cst_34 = arith.constant dense<0.000000e+00> : vector<4x8xf32>
    %58 = tpu.matmul %55, %57, %cst_34 {dimension_numbers = #tpu.dot_dimension_numbers<[1], [0], [0], [1], [0, 0, 1, 1], [], []>} : vector<4x4xf32>, vector<4x8xf32>, vector<4x8xf32> -> vector<4x8xf32>
    %59 = vector.extract_strided_slice %58 {offsets = [0, 0], sizes = [2, 4], strides = [1, 1]} : vector<4x8xf32> to vector<2x4xf32>
    %60 = vector.extract_strided_slice %58 {offsets = [2, 4], sizes = [2, 4], strides = [1, 1]} : vector<4x8xf32> to vector<2x4xf32>
    %61 = arith.subf %59, %60 : vector<2x4xf32>
    %c0_35 = arith.constant 0 : index
    %c3_36 = arith.constant 3 : index
    %c0_37 = arith.constant 0 : index
    %62 = vector.load %arg4[%c0_35, %c3_36, %c0_37] : memref<2x8x4xf32, #tpu.memory_space<vmem>>, vector<2x1x4xf32>
    %63 = vector.shape_cast %62 : vector<2x1x4xf32> to vector<2x4xf32>
    %64 = vector.shape_cast %61 : vector<2x4xf32> to vector<2x1x4xf32>
    tpu.vector_store %arg4[%c0_35, %c3_36, %c0_37], %64 {strides = array<i32>} : memref<2x8x4xf32, #tpu.memory_space<vmem>>, vector<2x1x4xf32>,
    %65 = vector.extract_strided_slice %58 {offsets = [0, 4], sizes = [2, 4], strides = [1, 1]} : vector<4x8xf32> to vector<2x4xf32>
    %66 = vector.extract_strided_slice %58 {offsets = [2, 0], sizes = [2, 4], strides = [1, 1]} : vector<4x8xf32> to vector<2x4xf32>
    %67 = arith.addf %65, %66 : vector<2x4xf32>
    %c0_38 = arith.constant 0 : index
    %c3_39 = arith.constant 3 : index
    %c0_40 = arith.constant 0 : index
    %68 = vector.load %arg5[%c0_38, %c3_39, %c0_40] : memref<2x8x4xf32, #tpu.memory_space<vmem>>, vector<2x1x4xf32>
    %69 = vector.shape_cast %68 : vector<2x1x4xf32> to vector<2x4xf32>
    %70 = vector.shape_cast %67 : vector<2x4xf32> to vector<2x1x4xf32>
    tpu.vector_store %arg5[%c0_38, %c3_39, %c0_40], %70 {strides = array<i32>} : memref<2x8x4xf32, #tpu.memory_space<vmem>>, vector<2x1x4xf32>,
    %71 = vector.extract_strided_slice %2 {offsets = [0, 4, 0], sizes = [4, 1, 4], strides = [1, 1, 1]} : vector<4x8x4xf32> to vector<4x1x4xf32>
    %72 = vector.shape_cast %71 : vector<4x1x4xf32> to vector<4x4xf32>
    %c4 = arith.constant 4 : index
    %c0_41 = arith.constant 0 : index
    %c0_42 = arith.constant 0 : index
    %73 = vector.load %arg3[%c4, %c0_41, %c0_42] : memref<8x4x8xf32, #tpu.memory_space<vmem>>, vector<1x4x8xf32>
    %74 = vector.shape_cast %73 : vector<1x4x8xf32> to vector<4x8xf32>
    %cst_43 = arith.constant dense<0.000000e+00> : vector<4x8xf32>
    %75 = tpu.matmul %72, %74, %cst_43 {dimension_numbers = #tpu.dot_dimension_numbers<[1], [0], [0], [1], [0, 0, 1, 1], [], []>} : vector<4x4xf32>, vector<4x8xf32>, vector<4x8xf32> -> vector<4x8xf32>
    %76 = vector.extract_strided_slice %75 {offsets = [0, 0], sizes = [2, 4], strides = [1, 1]} : vector<4x8xf32> to vector<2x4xf32>
    %77 = vector.extract_strided_slice %75 {offsets = [2, 4], sizes = [2, 4], strides = [1, 1]} : vector<4x8xf32> to vector<2x4xf32>
    %78 = arith.subf %76, %77 : vector<2x4xf32>
    %c0_44 = arith.constant 0 : index
    %c4_45 = arith.constant 4 : index
    %c0_46 = arith.constant 0 : index
    %79 = vector.load %arg4[%c0_44, %c4_45, %c0_46] : memref<2x8x4xf32, #tpu.memory_space<vmem>>, vector<2x1x4xf32>
    %80 = vector.shape_cast %79 : vector<2x1x4xf32> to vector<2x4xf32>
    %81 = vector.shape_cast %78 : vector<2x4xf32> to vector<2x1x4xf32>
    tpu.vector_store %arg4[%c0_44, %c4_45, %c0_46], %81 {strides = array<i32>} : memref<2x8x4xf32, #tpu.memory_space<vmem>>, vector<2x1x4xf32>,
    %82 = vector.extract_strided_slice %75 {offsets = [0, 4], sizes = [2, 4], strides = [1, 1]} : vector<4x8xf32> to vector<2x4xf32>
    %83 = vector.extract_strided_slice %75 {offsets = [2, 0], sizes = [2, 4], strides = [1, 1]} : vector<4x8xf32> to vector<2x4xf32>
    %84 = arith.addf %82, %83 : vector<2x4xf32>
    %c0_47 = arith.constant 0 : index
    %c4_48 = arith.constant 4 : index
    %c0_49 = arith.constant 0 : index
    %85 = vector.load %arg5[%c0_47, %c4_48, %c0_49] : memref<2x8x4xf32, #tpu.memory_space<vmem>>, vector<2x1x4xf32>
    %86 = vector.shape_cast %85 : vector<2x1x4xf32> to vector<2x4xf32>
    %87 = vector.shape_cast %84 : vector<2x4xf32> to vector<2x1x4xf32>
    tpu.vector_store %arg5[%c0_47, %c4_48, %c0_49], %87 {strides = array<i32>} : memref<2x8x4xf32, #tpu.memory_space<vmem>>, vector<2x1x4xf32>,
    %88 = vector.extract_strided_slice %2 {offsets = [0, 5, 0], sizes = [4, 1, 4], strides = [1, 1, 1]} : vector<4x8x4xf32> to vector<4x1x4xf32>
    %89 = vector.shape_cast %88 : vector<4x1x4xf32> to vector<4x4xf32>
    %c5 = arith.constant 5 : index
    %c0_50 = arith.constant 0 : index
    %c0_51 = arith.constant 0 : index
    %90 = vector.load %arg3[%c5, %c0_50, %c0_51] : memref<8x4x8xf32, #tpu.memory_space<vmem>>, vector<1x4x8xf32>
    %91 = vector.shape_cast %90 : vector<1x4x8xf32> to vector<4x8xf32>
    %cst_52 = arith.constant dense<0.000000e+00> : vector<4x8xf32>
    %92 = tpu.matmul %89, %91, %cst_52 {dimension_numbers = #tpu.dot_dimension_numbers<[1], [0], [0], [1], [0, 0, 1, 1], [], []>} : vector<4x4xf32>, vector<4x8xf32>, vector<4x8xf32> -> vector<4x8xf32>
    %93 = vector.extract_strided_slice %92 {offsets = [0, 0], sizes = [2, 4], strides = [1, 1]} : vector<4x8xf32> to vector<2x4xf32>
    %94 = vector.extract_strided_slice %92 {offsets = [2, 4], sizes = [2, 4], strides = [1, 1]} : vector<4x8xf32> to vector<2x4xf32>
    %95 = arith.subf %93, %94 : vector<2x4xf32>
    %c0_53 = arith.constant 0 : index
    %c5_54 = arith.constant 5 : index
    %c0_55 = arith.constant 0 : index
    %96 = vector.load %arg4[%c0_53, %c5_54, %c0_55] : memref<2x8x4xf32, #tpu.memory_space<vmem>>, vector<2x1x4xf32>
    %97 = vector.shape_cast %96 : vector<2x1x4xf32> to vector<2x4xf32>
    %98 = vector.shape_cast %95 : vector<2x4xf32> to vector<2x1x4xf32>
    tpu.vector_store %arg4[%c0_53, %c5_54, %c0_55], %98 {strides = array<i32>} : memref<2x8x4xf32, #tpu.memory_space<vmem>>, vector<2x1x4xf32>,
    %99 = vector.extract_strided_slice %92 {offsets = [0, 4], sizes = [2, 4], strides = [1, 1]} : vector<4x8xf32> to vector<2x4xf32>
    %100 = vector.extract_strided_slice %92 {offsets = [2, 0], sizes = [2, 4], strides = [1, 1]} : vector<4x8xf32> to vector<2x4xf32>
    %101 = arith.addf %99, %100 : vector<2x4xf32>
    %c0_56 = arith.constant 0 : index
    %c5_57 = arith.constant 5 : index
    %c0_58 = arith.constant 0 : index
    %102 = vector.load %arg5[%c0_56, %c5_57, %c0_58] : memref<2x8x4xf32, #tpu.memory_space<vmem>>, vector<2x1x4xf32>
    %103 = vector.shape_cast %102 : vector<2x1x4xf32> to vector<2x4xf32>
    %104 = vector.shape_cast %101 : vector<2x4xf32> to vector<2x1x4xf32>
    tpu.vector_store %arg5[%c0_56, %c5_57, %c0_58], %104 {strides = array<i32>} : memref<2x8x4xf32, #tpu.memory_space<vmem>>, vector<2x1x4xf32>,
    %105 = vector.extract_strided_slice %2 {offsets = [0, 6, 0], sizes = [4, 1, 4], strides = [1, 1, 1]} : vector<4x8x4xf32> to vector<4x1x4xf32>
    %106 = vector.shape_cast %105 : vector<4x1x4xf32> to vector<4x4xf32>
    %c6 = arith.constant 6 : index
    %c0_59 = arith.constant 0 : index
    %c0_60 = arith.constant 0 : index
    %107 = vector.load %arg3[%c6, %c0_59, %c0_60] : memref<8x4x8xf32, #tpu.memory_space<vmem>>, vector<1x4x8xf32>
    %108 = vector.shape_cast %107 : vector<1x4x8xf32> to vector<4x8xf32>
    %cst_61 = arith.constant dense<0.000000e+00> : vector<4x8xf32>
    %109 = tpu.matmul %106, %108, %cst_61 {dimension_numbers = #tpu.dot_dimension_numbers<[1], [0], [0], [1], [0, 0, 1, 1], [], []>} : vector<4x4xf32>, vector<4x8xf32>, vector<4x8xf32> -> vector<4x8xf32>
    %110 = vector.extract_strided_slice %109 {offsets = [0, 0], sizes = [2, 4], strides = [1, 1]} : vector<4x8xf32> to vector<2x4xf32>
    %111 = vector.extract_strided_slice %109 {offsets = [2, 4], sizes = [2, 4], strides = [1, 1]} : vector<4x8xf32> to vector<2x4xf32>
    %112 = arith.subf %110, %111 : vector<2x4xf32>
    %c0_62 = arith.constant 0 : index
    %c6_63 = arith.constant 6 : index
    %c0_64 = arith.constant 0 : index
    %113 = vector.load %arg4[%c0_62, %c6_63, %c0_64] : memref<2x8x4xf32, #tpu.memory_space<vmem>>, vector<2x1x4xf32>
    %114 = vector.shape_cast %113 : vector<2x1x4xf32> to vector<2x4xf32>
    %115 = vector.shape_cast %112 : vector<2x4xf32> to vector<2x1x4xf32>
    tpu.vector_store %arg4[%c0_62, %c6_63, %c0_64], %115 {strides = array<i32>} : memref<2x8x4xf32, #tpu.memory_space<vmem>>, vector<2x1x4xf32>,
    %116 = vector.extract_strided_slice %109 {offsets = [0, 4], sizes = [2, 4], strides = [1, 1]} : vector<4x8xf32> to vector<2x4xf32>
    %117 = vector.extract_strided_slice %109 {offsets = [2, 0], sizes = [2, 4], strides = [1, 1]} : vector<4x8xf32> to vector<2x4xf32>
    %118 = arith.addf %116, %117 : vector<2x4xf32>
    %c0_65 = arith.constant 0 : index
    %c6_66 = arith.constant 6 : index
    %c0_67 = arith.constant 0 : index
    %119 = vector.load %arg5[%c0_65, %c6_66, %c0_67] : memref<2x8x4xf32, #tpu.memory_space<vmem>>, vector<2x1x4xf32>
    %120 = vector.shape_cast %119 : vector<2x1x4xf32> to vector<2x4xf32>
    %121 = vector.shape_cast %118 : vector<2x4xf32> to vector<2x1x4xf32>
    tpu.vector_store %arg5[%c0_65, %c6_66, %c0_67], %121 {strides = array<i32>} : memref<2x8x4xf32, #tpu.memory_space<vmem>>, vector<2x1x4xf32>,
    %122 = vector.extract_strided_slice %2 {offsets = [0, 7, 0], sizes = [4, 1, 4], strides = [1, 1, 1]} : vector<4x8x4xf32> to vector<4x1x4xf32>
    %123 = vector.shape_cast %122 : vector<4x1x4xf32> to vector<4x4xf32>
    %c7 = arith.constant 7 : index
    %c0_68 = arith.constant 0 : index
    %c0_69 = arith.constant 0 : index
    %124 = vector.load %arg3[%c7, %c0_68, %c0_69] : memref<8x4x8xf32, #tpu.memory_space<vmem>>, vector<1x4x8xf32>
    %125 = vector.shape_cast %124 : vector<1x4x8xf32> to vector<4x8xf32>
    %cst_70 = arith.constant dense<0.000000e+00> : vector<4x8xf32>
    %126 = tpu.matmul %123, %125, %cst_70 {dimension_numbers = #tpu.dot_dimension_numbers<[1], [0], [0], [1], [0, 0, 1, 1], [], []>} : vector<4x4xf32>, vector<4x8xf32>, vector<4x8xf32> -> vector<4x8xf32>
    %127 = vector.extract_strided_slice %126 {offsets = [0, 0], sizes = [2, 4], strides = [1, 1]} : vector<4x8xf32> to vector<2x4xf32>
    %128 = vector.extract_strided_slice %126 {offsets = [2, 4], sizes = [2, 4], strides = [1, 1]} : vector<4x8xf32> to vector<2x4xf32>
    %129 = arith.subf %127, %128 : vector<2x4xf32>
    %c0_71 = arith.constant 0 : index
    %c7_72 = arith.constant 7 : index
    %c0_73 = arith.constant 0 : index
    %130 = vector.load %arg4[%c0_71, %c7_72, %c0_73] : memref<2x8x4xf32, #tpu.memory_space<vmem>>, vector<2x1x4xf32>
    %131 = vector.shape_cast %130 : vector<2x1x4xf32> to vector<2x4xf32>
    %132 = vector.shape_cast %129 : vector<2x4xf32> to vector<2x1x4xf32>
    tpu.vector_store %arg4[%c0_71, %c7_72, %c0_73], %132 {strides = array<i32>} : memref<2x8x4xf32, #tpu.memory_space<vmem>>, vector<2x1x4xf32>,
    %133 = vector.extract_strided_slice %126 {offsets = [0, 4], sizes = [2, 4], strides = [1, 1]} : vector<4x8xf32> to vector<2x4xf32>
    %134 = vector.extract_strided_slice %126 {offsets = [2, 0], sizes = [2, 4], strides = [1, 1]} : vector<4x8xf32> to vector<2x4xf32>
    %135 = arith.addf %133, %134 : vector<2x4xf32>
    %c0_74 = arith.constant 0 : index
    %c7_75 = arith.constant 7 : index
    %c0_76 = arith.constant 0 : index
    %136 = vector.load %arg5[%c0_74, %c7_75, %c0_76] : memref<2x8x4xf32, #tpu.memory_space<vmem>>, vector<2x1x4xf32>
    %137 = vector.shape_cast %136 : vector<2x1x4xf32> to vector<2x4xf32>
    %138 = vector.shape_cast %135 : vector<2x4xf32> to vector<2x1x4xf32>
    tpu.vector_store %arg5[%c0_74, %c7_75, %c0_76], %138 {strides = array<i32>} : memref<2x8x4xf32, #tpu.memory_space<vmem>>, vector<2x1x4xf32>,
    return
  }
  func.func @transform_0(%arg0: i32) -> (i32, i32, i32) {
    %c0_i32 = arith.constant 0 : i32
    %c0_i32_0 = arith.constant 0 : i32
    %c0_i32_1 = arith.constant 0 : i32
    return %c0_i32, %arg0, %c0_i32_0 : i32, i32, i32
  }
  func.func @transform_1(%arg0: i32) -> (i32, i32, i32) {
    %c0_i32 = arith.constant 0 : i32
    %c0_i32_0 = arith.constant 0 : i32
    %c0_i32_1 = arith.constant 0 : i32
    return %c0_i32, %arg0, %c0_i32_0 : i32, i32, i32
  }
  func.func @transform_2(%arg0: i32) -> (i32, i32, i32) {
    %c0_i32 = arith.constant 0 : i32
    %c0_i32_0 = arith.constant 0 : i32
    %c0_i32_1 = arith.constant 0 : i32
    return %arg0, %c0_i32, %c0_i32_0 : i32, i32, i32
  }
  func.func @transform_3(%arg0: i32) -> (i32, i32, i32) {
    %c0_i32 = arith.constant 0 : i32
    %c0_i32_0 = arith.constant 0 : i32
    %c0_i32_1 = arith.constant 0 : i32
    return %c0_i32, %arg0, %c0_i32_0 : i32, i32, i32
  }
  func.func @transform_4(%arg0: i32) -> (i32, i32, i32) {
    %c0_i32 = arith.constant 0 : i32
    %c0_i32_0 = arith.constant 0 : i32
    %c0_i32_1 = arith.constant 0 : i32
    return %c0_i32, %arg0, %c0_i32_0 : i32, i32, i32
  }
}

module attributes {stable_mosaic.version = 11 : i64} {
  func.func @kernel(%arg0: i32, %arg1: memref<512x4xf32, #tpu.memory_space<vmem>>, %arg2: memref<512x4xf32, #tpu.memory_space<vmem>>, %arg3: memref<4x4xf32, #tpu.memory_space<vmem>>, %arg4: memref<512x4xf32, #tpu.memory_space<vmem>>) attributes {dimension_semantics = [#tpu.dimension_semantics<parallel>], iteration_bounds = array<i64: 1>, scalar_prefetch = 0 : i64, scratch_operands = 0 : i64, tpu.core_type = #tpu.core_type<tc>, window_params = [{transform_indices = @transform_0, window_bounds = array<i64: 512, 4>}, {transform_indices = @transform_1, window_bounds = array<i64: 512, 4>}, {pipeline_mode = #tpu.pipeline_mode<synchronous>, transform_indices = @transform_2, window_bounds = array<i64: 4, 4>}, {transform_indices = @transform_3, window_bounds = array<i64: 512, 4>}]} {
    %c0 = arith.constant 0 : index
    %c0_0 = arith.constant 0 : index
    %0 = vector.load %arg1[%c0, %c0_0] : memref<512x4xf32, #tpu.memory_space<vmem>>, vector<512x4xf32>
    %c0_1 = arith.constant 0 : index
    %c0_2 = arith.constant 0 : index
    %1 = vector.load %arg2[%c0_1, %c0_2] : memref<512x4xf32, #tpu.memory_space<vmem>>, vector<512x4xf32>
    %c0_3 = arith.constant 0 : index
    %c0_4 = arith.constant 0 : index
    %2 = vector.load %arg3[%c0_3, %c0_4] : memref<4x4xf32, #tpu.memory_space<vmem>>, vector<4x4xf32>
    %cst = arith.constant dense<0.000000e+00> : vector<512x4xf32>
    %3 = tpu.matmul %1, %2, %cst {dimension_numbers = #tpu.dot_dimension_numbers<[1], [0], [0], [1], [0, 0, 1, 1], [], []>} : vector<512x4xf32>, vector<4x4xf32>, vector<512x4xf32> -> vector<512x4xf32>
    %4 = arith.addf %0, %3 : vector<512x4xf32>
    %c0_5 = arith.constant 0 : index
    %c0_6 = arith.constant 0 : index
    %5 = vector.load %arg2[%c0_5, %c0_6] : memref<512x4xf32, #tpu.memory_space<vmem>>, vector<512x4xf32>
    %6 = arith.addf %4, %5 : vector<512x4xf32>
    %c0_7 = arith.constant 0 : index
    %c0_8 = arith.constant 0 : index
    %7 = vector.load %arg4[%c0_7, %c0_8] : memref<512x4xf32, #tpu.memory_space<vmem>>, vector<512x4xf32>
    tpu.vector_store %arg4[%c0_7, %c0_8], %6 {strides = array<i32>} : memref<512x4xf32, #tpu.memory_space<vmem>>, vector<512x4xf32>,
    return
  }
  func.func @transform_0(%arg0: i32) -> (i32, i32) {
    %c0_i32 = arith.constant 0 : i32
    %c0_i32_0 = arith.constant 0 : i32
    return %arg0, %c0_i32 : i32, i32
  }
  func.func @transform_1(%arg0: i32) -> (i32, i32) {
    %c0_i32 = arith.constant 0 : i32
    %c0_i32_0 = arith.constant 0 : i32
    return %arg0, %c0_i32 : i32, i32
  }
  func.func @transform_2(%arg0: i32) -> (i32, i32) {
    %c0_i32 = arith.constant 0 : i32
    %c0_i32_0 = arith.constant 0 : i32
    %c0_i32_1 = arith.constant 0 : i32
    return %c0_i32, %c0_i32_0 : i32, i32
  }
  func.func @transform_3(%arg0: i32) -> (i32, i32) {
    %c0_i32 = arith.constant 0 : i32
    %c0_i32_0 = arith.constant 0 : i32
    return %arg0, %c0_i32 : i32, i32
  }
}

</mosaic_0001>

<bundles_post_ra>
// kernel: reverse.1
= control target key start
LH: loop header
LB: loop body
LE: loop exit
PB: predicated region body
PF: predicated region fallthrough
CT: control target
= control target key end

     0   :  { %v72_v3 = vlaneseq  ;;  %v65_v9 = vld [vmem:[#allocation0 + $0x7] ss:$-1 sm:$0xff]  ;;  %v79_v12 = vld [vmem:[#allocation0 + $0x17] ss:$-1 sm:$0xff]  ;;  %s331_s0 = inlined_call_operand.vmem [shape: f32[2,4,16,7], index: 0, kind: input, shape index: {}]   ;;  %s332_s1 = inlined_call_operand.vmem [shape: f32[2,4,16,7], index: 1, kind: output, shape index: {}]  }
   0x1   :  { %v45_v0 = vld [vmem:[%s331_s0] sm:$0xff]  ;;  %v47_v1 = vld [vmem:[%s331_s0 + $0x8] sm:$0xff]  ;;  %v49_v2 = vld [vmem:[%s331_s0 + $0x10] sm:$0xff]  ;;  %v66_v10 = vrot.slane %v65_v9, 1  ;;  %v80_v14 = vrot.slane %v79_v12, 1 }
   0x2   :  { %46 = vst [vmem:[#allocation0 + $0x8] sm:$0xff] %v45_v0  ;;  %48 = vst [vmem:[#allocation0 + $0x18] sm:$0xff] %v47_v1  ;;  %v51_v4 = vld [vmem:[%s331_s0 + $0x18] sm:$0xff]  ;;  %v53_v5 = vld [vmem:[%s331_s0 + $0x20] sm:$0xff]  ;;  %v73_v11 = vshrl.u32 %v72_v3, 7 }
   0x3   :  { %50 = vst [vmem:[#allocation0 + $0x28] sm:$0xff] %v49_v2  ;;  %v55_v6 = vld [vmem:[%s331_s0 + $0x28] sm:$0xff]  ;;  %52 = vst [vmem:[#allocation0 + $0x38] sm:$0xff] %v51_v4  ;;  %v57_v7 = vld [vmem:[%s331_s0 + $0x30] sm:$0xff] }
   0x4   :  { %54 = vst [vmem:[#allocation0 + $0x48] sm:$0xff] %v53_v5  ;;  %56 = vst [vmem:[#allocation0 + $0x58] sm:$0xff] %v55_v6  ;;  %v59_v8 = vld [vmem:[%s331_s0 + $0x38] sm:$0xff]  ;;  %v93_v13 = vld [vmem:[#allocation0 + $0x27] ss:$-1 sm:$0xff]  ;;  %vm74_vm0 = vcmp.lt.s32.totalorder %v73_v11, 7 }
   0x5   :  { %58 = vst [vmem:[#allocation0 + $0x68] sm:$0xff] %v57_v7  ;;  %60 = vst [vmem:[#allocation0 + $0x78] sm:$0xff] %v59_v8  ;;  %v94_v15 = vrot.slane %v93_v13, 1  ;;  %v107_v16 = vld [vmem:[#allocation0 + $0x37] ss:$-1 sm:$0xff] }
   0x6   :  { %67 = vst [vmem:[#allocation1] sm:$0xff] %v66_v10  ;;  %v108_v17 = vrot.slane %v107_v16, 1  ;;  %v121_v18 = vld [vmem:[#allocation0 + $0x47] ss:$-1 sm:$0xff]  ;;  %v135_v19 = vld [vmem:[#allocation0 + $0x57] ss:$-1 sm:$0xff] }
   0x7   :  { %81 = vst [vmem:[#allocation1 + $0x8] sm:$0xff] %v80_v14  ;;  %95 = vst [vmem:[#allocation1 + $0x10] sm:$0xff] %v94_v15  ;;  %v122_v20 = vrot.slane %v121_v18, 1  ;;  %v136_v21 = vrot.slane %v135_v19, 1  ;;  %v149_v22 = vld [vmem:[#allocation0 + $0x67] ss:$-1 sm:$0xff] }
   0x8   :  { %v163_v23 = vld [vmem:[#allocation0 + $0x77] ss:$-1 sm:$0xff]  ;;  %109 = vst [vmem:[#allocation1 + $0x18] sm:$0xff] %v108_v17  ;;  %v150_v24 = vrot.slane %v149_v22, 1 }
   0x9   :  { %v164_v25 = vrot.slane %v163_v23, 1  ;;  %v70_v26 = vld [vmem:[#allocation0 + $0xf] ss:$-1 sm:$0xff]  ;;  %v84_v27 = vld [vmem:[#allocation0 + $0x1f] ss:$-1 sm:$0xff]  ;;  %123 = vst [vmem:[#allocation1 + $0x20] sm:$0xff] %v122_v20 }
   0xa   :  { %v98_v28 = vld [vmem:[#allocation0 + $0x2f] ss:$-1 sm:$0xff]  ;;  %137 = vst [vmem:[#allocation1 + $0x28] sm:$0xff] %v136_v21  ;;  %v71_v29 = vrot.slane %v70_v26, 1  ;;  %v85_v30 = vrot.slane %v84_v27, 1  ;;  %151 = vst [vmem:[#allocation1 + $0x30] sm:$0xff] %v150_v24 }
   0xb   :  { %v99_v31 = vrot.slane %v98_v28, 1  ;;  %v112_v32 = vld [vmem:[#allocation0 + $0x3f] ss:$-1 sm:$0xff]  ;;  %165 = vst [vmem:[#allocation1 + $0x38] sm:$0xff] %v164_v25  ;;  %v126_v34 = vld [vmem:[#allocation0 + $0x4f] ss:$-1 sm:$0xff] }
   0xc   :  { %v113_v33 = vrot.slane %v112_v32, 1  ;;  %v140_v35 = vld [vmem:[#allocation0 + $0x5f] ss:$-1 sm:$0xff]  ;;  %75 = vst.msk [vmem:[#allocation1] sm:$0xff] %vm74_vm0, %v71_v29  ;;  %89 = vst.msk [vmem:[#allocation1 + $0x8] sm:$0xff] %vm74_vm0, %v85_v30  ;;  %v127_v36 = vrot.slane %v126_v34, 1 }
   0xd   :  { %103 = vst.msk [vmem:[#allocation1 + $0x10] sm:$0xff] %vm74_vm0, %v99_v31  ;;  %v141_v37 = vrot.slane %v140_v35, 1  ;;  %v154_v38 = vld [vmem:[#allocation0 + $0x6f] ss:$-1 sm:$0xff]  ;;  %v168_v39 = vld [vmem:[#allocation0 + $0x7f] ss:$-1 sm:$0xff] }
   0xe   :  { %117 = vst.msk [vmem:[#allocation1 + $0x18] sm:$0xff] %vm74_vm0, %v113_v33  ;;  %v155_v40 = vrot.slane %v154_v38, 1  ;;  %v169_v41 = vrot.slane %v168_v39, 1  ;;  %131 = vst.msk [vmem:[#allocation1 + $0x20] sm:$0xff] %vm74_vm0, %v127_v36 }
   0xf   :  { %145 = vst.msk [vmem:[#allocation1 + $0x28] sm:$0xff] %vm74_vm0, %v141_v37 }
  0x10   :  { %159 = vst.msk [vmem:[#allocation1 + $0x30] sm:$0xff] %vm74_vm0, %v155_v40  ;;  %173 = vst.msk [vmem:[#allocation1 + $0x38] sm:$0xff] %vm74_vm0, %v169_v41 }
  0x13   :  { %v216_v42 = vld [vmem:[#allocation1] sm:$0xff]  ;;  %v218_v43 = vld [vmem:[#allocation1 + $0x8] sm:$0xff] }
  0x14   :  { %v220_v44 = vld [vmem:[#allocation1 + $0x10] sm:$0xff]  ;;  %217 = vst [vmem:[%s332_s1] sm:$0xff] %v216_v42  ;;  %219 = vst [vmem:[%s332_s1 + $0x8] sm:$0xff] %v218_v43 }
  0x15   :  { %221 = vst [vmem:[%s332_s1 + $0x10] sm:$0xff] %v220_v44  ;;  %v222_v45 = vld [vmem:[#allocation1 + $0x18] sm:$0xff]  ;;  %v224_v46 = vld [vmem:[#allocation1 + $0x20] sm:$0xff] }
  0x16   :  { %223 = vst [vmem:[%s332_s1 + $0x18] sm:$0xff] %v222_v45  ;;  %v226_v47 = vld [vmem:[#allocation1 + $0x28] sm:$0xff]  ;;  %225 = vst [vmem:[%s332_s1 + $0x20] sm:$0xff] %v224_v46 }
  0x17   :  { %227 = vst [vmem:[%s332_s1 + $0x28] sm:$0xff] %v226_v47  ;;  %v228_v48 = vld [vmem:[#allocation1 + $0x30] sm:$0xff]  ;;  %v230_v49 = vld [vmem:[#allocation1 + $0x38] sm:$0xff] }
  0x18   :  { %229 = vst [vmem:[%s332_s1 + $0x30] sm:$0xff] %v228_v48  ;;  %231 = vst [vmem:[%s332_s1 + $0x38] sm:$0xff] %v230_v49 }

// kernel: a_call__.2
= control target key start
LH: loop header
LB: loop body
LE: loop exit
PB: predicated region body
PF: predicated region fallthrough
CT: control target
= control target key end

     0   :  { %s1997_s15 = smov 0   ;;  %s1999_s16 = smov 0   ;;  %s2418_s0 = inlined_call_operand.vmem [shape: f32[2,40,4], index: 0, kind: input, shape index: {}]   ;;  %s2419_s1 = inlined_call_operand.vmem [shape: f32[2,40,4], index: 1, kind: input, shape index: {}]   ;;  %s2420_s2 = inlined_call_operand.vmem [shape: f32[40,4,8], index: 2, kind: input, shape index: {}]   ;;  %s2421_s3 = inlined_call_operand.vmem [shape: f32[2,40,4], index: 3, kind: output, shape index: {0}]   ;;  %s2422_s4 = inlined_call_operand.vmem [shape: f32[2,40,4], index: 4, kind: output, shape index: {1}]  }
   0x1   :  { %s2001_s17 = smov 0  }
   0x2 LB: > { %s1814_s18 = sadd.s32 4294967295, %s1965_s17   ;;  %s2014_s19 = sadd.s32 1, %s1965_s17   ;;  %s1965_s17 = sphi %s2001_s17, %s2427_s17   ;;  %s1961_s16 = sphi %s1999_s16, %s2426_s16   ;;  %s1957_s15 = sphi %s1997_s15, %s2425_s15  }
   0x3   : > { %s19_s20 = ssub.s32 %s1965_s17, %s2014_s19  ;;  %s22_s21 = sadd.s32 1, %s1961_s16 }
   0x4   : > { %p20_p0 = scmp.eq.s32.totalorder %s19_s20, 0  ;;  %p29_p1 = scmp.ne.s32.totalorder %s1961_s16, %s1957_s15 }
   0x5   : > { %p30_p2 = scmp.eq.s32.totalorder %s1965_s17, 0  ;;  %p111_p3 = scmp.eq.s32.totalorder %s1814_s18, 4 }
   0x6   : > { %s2025_s22 = scalar_select %p20_p0, %s1961_s16, %s22_s21  }
   0x7   : > { %p2027_p4 = por %p30_p2, %p29_p1  ;;  %p2031_p5 = por %p111_p3, %p29_p1 }
   0x8   : > { %p1817_p6 = scmp.ge.s32.totalorder %s1965_s17, 5 }
   0xa   : > { %159 = sbr.rel (%p1817_p6) target bundleno = 25 (0x19), region = 16 }
   0xf   : > { %162 = sbr.rel (!%p2027_p4) target bundleno = 20 (0x14), region = 20  ;;  %s164_s25 = sand.u32 (%p2027_p4), 1, %s1961_s16  }
  0x10   : > { %s1819_s26 = sshll.u32 (%p2027_p4), %s1965_s17, 3  ;;  %s1818_s27 = sshll.u32 (%p2027_p4), %s164_s25, 4 }
  0x11   : > { %s168_s30 = scalar_lea.vmem (%p2027_p4), %s2418_s0, %s1819_s26  ;;  %s166_s5 = scalar_lea.vmem (%p2027_p4), [#allocation2], %s1818_s27 }
  0x12   : > { %v199_v0 = vld [vmem:[%s168_s30] sm:$0xff] (%p2027_p4)  ;;  %v201_v1 = vld [vmem:[%s168_s30 + $0x28] sm:$0xff] (%p2027_p4) }
  0x13   : > { %200 = vst [vmem:[%s166_s5] sm:$0xff] (%p2027_p4), %v199_v0  ;;  %202 = vst [vmem:[%s166_s5 + $0x8] sm:$0xff] (%p2027_p4), %v201_v1 }
  0x14 PF: > { %208 = sbr.rel (!%p2027_p4) target bundleno = 25 (0x19), region = 58  ;;  %s210_s6 = sand.u32 (%p2027_p4), 1, %s1961_s16  }
  0x15   : > { %s1821_s7 = sshll.u32 (%p2027_p4), %s1965_s17, 3  ;;  %s1820_s8 = sshll.u32 (%p2027_p4), %s210_s6, 4 }
  0x16   : > { %s214_s11 = scalar_lea.vmem (%p2027_p4), %s2419_s1, %s1821_s7  ;;  %s212_s12 = scalar_lea.vmem (%p2027_p4), [#allocation3], %s1820_s8 }
  0x17   : > { %v245_v2 = vld [vmem:[%s214_s11] sm:$0xff] (%p2027_p4)  ;;  %v247_v3 = vld [vmem:[%s214_s11 + $0x28] sm:$0xff] (%p2027_p4) }
  0x18   : > { %246 = vst [vmem:[%s212_s12] sm:$0xff] (%p2027_p4), %v245_v2  ;;  %248 = vst [vmem:[%s212_s12 + $0x8] sm:$0xff] (%p2027_p4), %v247_v3 }
  0x19 PF: > { %p1822_p7 = scmp.ge.s32.totalorder %s1965_s17, 1  ;;  %p262_p8 = scmp.lt.s32.totalorder %s1965_s17, 6 }
  0x1b   : > { %p263_p9 = pnand %p1822_p7, %p262_p8 }
  0x1c   : > { %s2054_s13 = sshll.u32 (!%p263_p9), %s1814_s18, 3  ;;  %s269_s14 = sand.u32 (!%p263_p9), 1, %s1957_s15  }
  0x1d   : > { %266 = sbr.rel (%p263_p9) target bundleno = 514 (0x202), region = 100  ;;  %p314_p10 = scmp.lt.s32.totalorder (!%p263_p9), %s2054_s13, 39 }
  0x1e   : > { %s2061_s20 = sshll.u32 (!%p263_p9), %s269_s14, 4  ;;  %s1969_s27 = smov (!%p263_p9), 4  }
  0x1f   : > { %s271_s17 = scalar_lea.vmem (!%p263_p9), [#allocation2], %s2061_s20  ;;  %s278_s18 = scalar_lea.vmem (!%p263_p9), [#allocation3], %s2061_s20 }
  0x20   : > { %s1970_s28 = smov (!%p263_p9), 124   ;;  %s2274_s29 = scalar_lea.vmem (!%p263_p9), [#allocation4], %s2061_s20 }
  0x21   : > { %s2358_s30 = scalar_lea.vmem (!%p263_p9), [#allocation5], %s2061_s20 }
  0x22   : > { %v1967_v4 = vmov 0.0   ;;  %vm1968_vm0 = vmmov 0   ;;  %vm340_vm1 = vcmask 1043456   ;;  %vm329_vm2 = vcmask 1041409   ;;  %s315_s15 = scalar_select %p314_p10, %s2054_s13, 39  ;;  %v2068_v5 = vld [vmem:[%s271_s17] sm:$0xff] }
  0x23   : > { %1874 = vmatprep.subr.mxu0 %v1967_v4  ;;  %1876 = vmatprep.mubr.msk.f32.mxu0 %vm1968_vm0, %v1967_v4  ;;  %v2070_v6 = vld [vmem:[%s271_s17 + $0x8] sm:$0xff]  ;;  %v2073_v7 = vld [vmem:[%s278_s18] sm:$0xff]  ;;  %vm332_vm3 = vcmask 1042434   ;;  %vm335_vm4 = vcmask 1043459   ;;  %vm337_vm5 = vcmask 31744   ;;  %v493_v11 = vrot.slane %v2068_v5, 1  ;;  %s1620_s7 = scalar_lea.vmem (%p2031_p5), %s2421_s3, %s2054_s13 }
  0x24   : > { %1879 = vmatprep.subr.mxu1 %v1967_v4  ;;  %1881 = vmatprep.mubr.msk.f32.mxu1 %vm1968_vm0, %v1967_v4  ;;  %v2075_v8 = vld [vmem:[%s278_s18 + $0x8] sm:$0xff]  ;;  %v328_v9 = vrot.slane %v2070_v6, 7  ;;  %v331_v10 = vrot.slane %v2073_v7, 6  ;;  %s1828_s21 = sshll.u32 %s315_s15, 2  ;;  %v495_v13 = vrot.slane %v2073_v7, 7  ;;  %v652_v15 = vrot.slane %v2068_v5, 2 }
  0x25   : > { %v334_v12 = vrot.slane %v2075_v8, 5  ;;  %v497_v14 = vrot.slane %v2075_v8, 6  ;;  %s2087_s26 = scalar_lea.vmem %s2420_s2, %s1828_s21  ;;  %v494_v17 = vsel %vm329_vm2, %v2070_v6, %v493_v11  ;;  %v653_v18 = vrot.slane %v2070_v6, 1 }
  0x26   : > { %v330_v16 = vsel %vm329_vm2, %v328_v9, %v2068_v5  ;;  %v656_v19 = vrot.slane %v2075_v8, 7  ;;  %v323_v20 = vld [vmem:[%s2087_s26] sm:$0xf]  ;;  %v1831_v22 = vld [vmem:[%s2087_s26 + $0x4] sm:$0xf]  ;;  %v496_v23 = vsel %vm332_vm3, %v495_v13, %v494_v17  ;;  %v811_v28 = vrot.slane %v2068_v5, 3 }
  0x27   : > { %v333_v21 = vsel %vm332_vm3, %v331_v10, %v330_v16  ;;  %1875 = vmatpush3.msk.msra.mxu0 %vm340_vm1, %v323_v20  ;;  %1880 = vmatpush3.msk.msra.mxu1 %vm340_vm1, %v1831_v22  ;;  %v498_v25 = vsel %vm335_vm4, %v497_v14, %v496_v23  ;;  %v1834_v26 = vld [vmem:[%s2087_s26 + $0x8] sm:$0xf]  ;;  %v654_v27 = vsel %vm329_vm2, %v653_v18, %v652_v15  ;;  %v1837_v30 = vld [vmem:[%s2087_s26 + $0xc] sm:$0xf]  ;;  %v812_v31 = vrot.slane %v2070_v6, 2 }
  0x28   : > { %v336_v24 = vsel %vm335_vm4, %v334_v12, %v333_v21  ;;  %1882 = vmatmul.mubr.msk.f32.vlgmr.msra.gmra.mxu1 %vm337_vm5, %v498_v25  ;;  %v655_v29 = vsel %vm332_vm3, %v2073_v7, %v654_v27  ;;  %v814_v32 = vrot.slane %v2073_v7, 1  ;;  %v970_v33 = vrot.slane %v2068_v5, 4  ;;  %1884 = vmatprep.subr.mxu0 %v1967_v4  ;;  %v1840_v38 = vld [vmem:[%s2087_s26 + $0x10] sm:$0xf]  ;;  %v1843_v49 = vld [vmem:[%s2087_s26 + $0x14] sm:$0xf] }
  0x29   : > { %1877 = vmatmul.mubr.msk.f32.vlgmr.msra.gmra.mxu0 %vm337_vm5, %v336_v24  ;;  %v657_v34 = vsel %vm335_vm4, %v656_v19, %v655_v29  ;;  %v971_v35 = vrot.slane %v2070_v6, 3  ;;  %v973_v36 = vrot.slane %v2073_v7, 2  ;;  %v975_v37 = vrot.slane %v2075_v8, 1  ;;  %1889 = vmatprep.subr.mxu1 %v1967_v4  ;;  %v1846_v56 = vld [vmem:[%s2087_s26 + $0x18] sm:$0xf] }
  0x2a   : > { %1886 = vmatprep.mubr.msk.f32.mxu0 %vm1968_vm0, %v1967_v4  ;;  %1885 = vmatpush3.msk.msra.mxu0 %vm340_vm1, %v1834_v26  ;;  %v813_v39 = vsel %vm329_vm2, %v812_v31, %v811_v28  ;;  %v1130_v40 = vrot.slane %v2068_v5, 5  ;;  %v1131_v41 = vrot.slane %v2070_v6, 4  ;;  %v1133_v42 = vrot.slane %v2073_v7, 3  ;;  %v1849_v0 = vld [vmem:[%s2087_s26 + $0x1c] sm:$0xf] }
  0x2b   : > { %1894 = vmatprep.subr.mxu0 %v1967_v4  ;;  %1890 = vmatpush3.msk.msra.mxu1 %vm340_vm1, %v1837_v30  ;;  %v815_v43 = vsel %vm332_vm3, %v814_v32, %v813_v39  ;;  %v972_v44 = vsel %vm329_vm2, %v971_v35, %v970_v33  ;;  %v1135_v45 = vrot.slane %v2075_v8, 2  ;;  %v1290_v46 = vrot.slane %v2068_v5, 6 }
  0x2c   : > { %1891 = vmatprep.mubr.msk.f32.mxu1 %vm1968_vm0, %v1967_v4  ;;  %v816_v47 = vsel %vm335_vm4, %v2075_v8, %v815_v43  ;;  %v974_v48 = vsel %vm332_vm3, %v973_v36, %v972_v44  ;;  %v1132_v50 = vsel %vm329_vm2, %v1131_v41, %v1130_v40  ;;  %v1291_v51 = vrot.slane %v2070_v6, 5  ;;  %1899 = vmatprep.subr.mxu1 %v1967_v4 }
  0x2d   : > { %1887 = vmatmul.mubr.msk.f32.vlgmr.msra.gmra.mxu0 %vm337_vm5, %v657_v34  ;;  %v976_v52 = vsel %vm335_vm4, %v975_v37, %v974_v48  ;;  %v1134_v53 = vsel %vm332_vm3, %v1133_v42, %v1132_v50  ;;  %v1293_v54 = vrot.slane %v2073_v7, 4  ;;  %v1295_v55 = vrot.slane %v2075_v8, 3  ;;  %1892 = vmatmul.mubr.msk.f32.vlgmr.msra.gmra.mxu1 %vm337_vm5, %v816_v47 }
  0x2e   : > { %1895 = vmatpush3.msk.msra.mxu0 %vm340_vm1, %v1840_v38  ;;  %1896 = vmatprep.mubr.msk.f32.mxu0 %vm1968_vm0, %v1967_v4  ;;  %v1292_v57 = vsel %vm329_vm2, %v1291_v51, %v1290_v46  ;;  %v1450_v58 = vrot.slane %v2068_v5, 7  ;;  %v1451_v59 = vrot.slane %v2070_v6, 6  ;;  %v1136_v60 = vsel %vm335_vm4, %v1135_v45, %v1134_v53 }
  0x2f   : > { %1904 = vmatprep.subr.mxu0 %v1967_v4  ;;  %1900 = vmatpush3.msk.msra.mxu1 %vm340_vm1, %v1843_v49  ;;  %v1294_v61 = vsel %vm332_vm3, %v1293_v54, %v1292_v57  ;;  %v1453_v62 = vrot.slane %v2073_v7, 5  ;;  %v1455_v63 = vrot.slane %v2075_v8, 4  ;;  %v1971_v29 = vmov 1966171168  }
  0x30   : > { %1901 = vmatprep.mubr.msk.f32.mxu1 %vm1968_vm0, %v1967_v4  ;;  %v1452_v1 = vsel %vm329_vm2, %v1451_v59, %v1450_v58  ;;  %v1296_v2 = vsel %vm335_vm4, %v1295_v55, %v1294_v61  ;;  %1909 = vmatprep.subr.mxu1 %v1967_v4  ;;  %v422_v30 = vunpack.c.l.s4 %v1971_v29  ;;  %v424_v31 = vlaneseq }
  0x31   : > { %1897 = vmatmul.mubr.msk.f32.vlgmr.msra.gmra.mxu0 %vm337_vm5, %v976_v52  ;;  %v1454_v3 = vsel %vm332_vm3, %v1453_v62, %v1452_v1  ;;  %1902 = vmatmul.mubr.msk.f32.vlgmr.msra.gmra.mxu1 %vm337_vm5, %v1136_v60  ;;  %vm445_vm6 = vcmask 24576  }
  0x32   : > { %1905 = vmatpush3.msk.msra.mxu0 %vm340_vm1, %v1846_v56  ;;  %1906 = vmatprep.mubr.msk.f32.mxu0 %vm1968_vm0, %v1967_v4  ;;  %v1456_v5 = vsel %vm335_vm4, %v1455_v63, %v1454_v3  ;;  %v423_v32 = vunpack.c.0.s8 %v422_v30  ;;  %v425_v33 = vshrl.u32 %v424_v31, 7 }
  0x33   : > { %1910 = vmatpush3.msk.msra.mxu1 %vm340_vm1, %v1849_v0  ;;  %1911 = vmatprep.mubr.msk.f32.mxu1 %vm1968_vm0, %v1967_v4 }
  0x34   : > { %v2212_v34 = vsub.s32 %v423_v32, %v425_v33  ;;  %v2216_v38 = vsub.s32 0, %v425_v33 }
  0x35   : > { %1907 = vmatmul.mubr.msk.f32.vlgmr.msra.gmra.mxu0 %vm337_vm5, %v1296_v2  ;;  %1912 = vmatmul.mubr.msk.f32.vlgmr.msra.gmra.mxu1 %vm337_vm5, %v1456_v5 }
  0xe8   : > { %v2182_v7 = vpop.f32.mrf.mxu1 }
  0xe9   : > { %v2180_v6 = vpop.f32.mrf.mxu0  ;;  %v575_v11 = vrot.slane %v2182_v7, 2 }
  0xea   : > { %v415_v8 = vrot.slane %v2180_v6, 2  ;;  %v1883_v10 = vpop.f32.mrf.mxu1 }
  0xeb   : > { %v1878_v9 = vpop.f32.mrf.mxu0 }
  0xec   : > { %448 = vrot.lane.b32.xlu0 %v415_v8, %s1969_s27 }
  0xed   : > { %v2186_v12 = vpop.f32.mrf.mxu0  ;;  %v2189_v14 = vpop.f32.mrf.mxu1 }
  0xee   : > { %v734_v4 = vrot.slane %v2186_v12, 2  ;;  %v893_v15 = vrot.slane %v2189_v14, 2 }
  0xef   : > { %v1888_v13 = vpop.f32.mrf.mxu0  ;;  %v1893_v17 = vpop.f32.mrf.mxu1 }
  0xf0   : > { %607 = vrot.lane.b32.xlu0 %v575_v11, %s1969_s27  ;;  %766 = vrot.lane.b32.xlu1 %v734_v4, %s1969_s27 }
  0xf1   : > { %v2192_v16 = vpop.f32.mrf.mxu0  ;;  %v2195_v20 = vpop.f32.mrf.mxu1 }
  0xf2   : > { %v1053_v18 = vrot.slane %v2192_v16, 2  ;;  %v1213_v21 = vrot.slane %v2195_v20, 2 }
  0xf3   : > { %v1898_v19 = vpop.f32.mrf.mxu0  ;;  %v1903_v23 = vpop.f32.mrf.mxu1 }
  0xf4   : > { %925 = vrot.lane.b32.xlu1 %v893_v15, %s1969_s27  ;;  %1085 = vrot.lane.b32.xlu0 %v1053_v18, %s1969_s27 }
  0xf5   : > { %v2198_v22 = vpop.f32.mrf.mxu0  ;;  %v2201_v25 = vpop.f32.mrf.mxu1 }
  0xf6   : > { %v1373_v24 = vrot.slane %v2198_v22, 2  ;;  %v1533_v27 = vrot.slane %v2201_v25, 2 }
  0xf7   : > { %v1908_v26 = vpop.f32.mrf.mxu0  ;;  %v1913_v28 = vpop.f32.mrf.mxu1 }
  0xf8   : > { %1245 = vrot.lane.b32.xlu1 %v1213_v21, %s1969_s27  ;;  %1405 = vrot.lane.b32.xlu0 %v1373_v24, %s1969_s27 }
  0xfc   : > { %1565 = vrot.lane.b32.xlu1 %v1533_v27, %s1969_s27  ;;  %416 = vrot.lane.b32.xlu0 %v415_v8, %s1970_s28 }
 0x100   : > { %576 = vrot.lane.b32.xlu1 %v575_v11, %s1970_s28  ;;  %735 = vrot.lane.b32.xlu0 %v734_v4, %s1970_s28 }
 0x104   : > { %894 = vrot.lane.b32.xlu1 %v893_v15, %s1970_s28  ;;  %1054 = vrot.lane.b32.xlu0 %v1053_v18, %s1970_s28 }
 0x108   : > { %1214 = vrot.lane.b32.xlu1 %v1213_v21, %s1970_s28  ;;  %1374 = vrot.lane.b32.xlu0 %v1373_v24, %s1970_s28 }
 0x10c   : > { %1534 = vrot.lane.b32.xlu1 %v1533_v27, %s1970_s28 }
 0x15e   : > { %v449_v35 = vpop.permute.xlu0 %448 }
 0x15f   : > { %v451_v36 = vadd.f32 %v449_v35, %v2180_v6 }
 0x161   : > { %v459_v37 = vrot.slane %v451_v36, %v2212_v34 }
 0x162   : > { %v608_v39 = vpop.permute.xlu0 %607  ;;  %v767_v40 = vpop.permute.xlu1 %766 }
 0x163   : > { %v460_v41 = vcombine.high %v459_v37, %v459_v37  ;;  %v467_v42 = vrot.slane %v459_v37, %v2212_v34  ;;  %v610_v43 = vadd.f32 %v608_v39, %v2182_v7  ;;  %v769_v44 = vadd.f32 %v767_v40, %v2186_v12 }
 0x165   : > { %v618_v45 = vrot.slane %v610_v43, %v2212_v34  ;;  %v777_v46 = vrot.slane %v769_v44, %v2212_v34  ;;  %v478_v47 = vrot.slane %v467_v42, %v2216_v38  ;;  %v474_v48 = vrot.slane %v460_v41, %v2212_v34 }
 0x166   : > { %v926_v49 = vpop.permute.xlu1 %925  ;;  %v1086_v50 = vpop.permute.xlu0 %1085 }
 0x167   : > { %v619_v51 = vcombine.high %v618_v45, %v618_v45  ;;  %v626_v52 = vrot.slane %v618_v45, %v2212_v34  ;;  %483 = vrot.lane.b32.xlu0 %v478_v47, %s1970_s28  ;;  %v778_v53 = vcombine.high %v777_v46, %v777_v46  ;;  %v928_v54 = vadd.f32 %v926_v49, %v2189_v14 }
 0x168   : > { %v1088_v55 = vadd.f32 %v1086_v50, %v2192_v16  ;;  %v482_v56 = vrot.slane %v474_v48, %v2216_v38  ;;  %v785_v57 = vrot.slane %v777_v46, %v2212_v34 }
 0x169   : > { %v637_v58 = vrot.slane %v626_v52, %v2216_v38  ;;  %v633_v59 = vrot.slane %v619_v51, %v2212_v34  ;;  %v936_v60 = vrot.slane %v928_v54, %v2212_v34  ;;  %v792_v3 = vrot.slane %v778_v53, %v2212_v34 }
 0x16a   : > { %485 = vrot.lane.b32.xlu1 %v482_v56, %s1970_s28  ;;  %v1246_v61 = vpop.permute.xlu1 %1245  ;;  %v1406_v62 = vpop.permute.xlu0 %1405  ;;  %v1096_v2 = vrot.slane %v1088_v55, %v2212_v34  ;;  %v796_v8 = vrot.slane %v785_v57, %v2216_v38 }
 0x16b   : > { %v1248_v63 = vadd.f32 %v1246_v61, %v2195_v20  ;;  %642 = vrot.lane.b32.xlu0 %v637_v58, %s1970_s28  ;;  %v641_v0 = vrot.slane %v633_v59, %v2216_v38  ;;  %v937_v1 = vcombine.high %v936_v60, %v936_v60  ;;  %v944_v5 = vrot.slane %v936_v60, %v2212_v34 }
 0x16c   : > { %v1408_v10 = vadd.f32 %v1406_v62, %v2198_v22  ;;  %v1097_v13 = vcombine.high %v1096_v2, %v1096_v2  ;;  %v800_v17 = vrot.slane %v792_v3, %v2216_v38  ;;  %v1104_v19 = vrot.slane %v1096_v2, %v2212_v34 }
 0x16d   : > { %v1256_v9 = vrot.slane %v1248_v63, %v2212_v34  ;;  %v951_v18 = vrot.slane %v937_v1, %v2212_v34  ;;  %v955_v21 = vrot.slane %v944_v5, %v2216_v38 }
 0x16e   : > { %644 = vrot.lane.b32.xlu1 %v641_v0, %s1970_s28  ;;  %v1566_v11 = vpop.permute.xlu1 %1565  ;;  %v417_v4 = vpop.permute.xlu0 %416  ;;  %v2252_v24 = vrot.slane %v1408_v10, %v2212_v34  ;;  %v1111_v35 = vrot.slane %v1097_v13, %v2212_v34  ;;  %v1115_v40 = vrot.slane %v1104_v19, %v2216_v38 }
 0x16f   : > { %801 = vrot.lane.b32.xlu0 %v796_v8, %s1970_s28  ;;  %v419_v15 = vsub.f32 %v2180_v6, %v417_v4  ;;  %v1257_v23 = vcombine.high %v1256_v9, %v1256_v9  ;;  %v1568_v26 = vadd.f32 %v1566_v11, %v2201_v25  ;;  %v959_v33 = vrot.slane %v951_v18, %v2216_v38 }
 0x170   : > { %v1264_v36 = vrot.slane %v1256_v9, %v2212_v34  ;;  %v1119_v51 = vrot.slane %v1111_v35, %v2216_v38  ;;  %v1424_v52 = vrot.slane %v2252_v24, %v2212_v34 }
 0x171   : > { %v427_v27 = vrot.slane %v419_v15, %v2212_v34  ;;  %v1271_v44 = vrot.slane %v1257_v23, %v2212_v34 }
 0x172   : > { %803 = vrot.lane.b32.xlu1 %v800_v17, %s1970_s28  ;;  %v577_v28 = vpop.permute.xlu1 %576  ;;  %v736_v6 = vpop.permute.xlu0 %735  ;;  %v1275_v55 = vrot.slane %v1264_v36, %v2216_v38 }
 0x173   : > { %v579_v29 = vsub.f32 %v2182_v7, %v577_v28  ;;  %v738_v30 = vsub.f32 %v2186_v12, %v736_v6  ;;  %960 = vrot.lane.b32.xlu0 %v955_v21, %s1970_s28  ;;  %v428_v31 = vcombine.high %v427_v27, %v427_v27  ;;  %v435_v32 = vrot.slane %v427_v27, %v2212_v34 }
 0x174   : > { %v1417_v7 = vcombine.high %v2252_v24, %v2252_v24  ;;  %v2270_v12 = vrot.slane %v1568_v26, %v2212_v34  ;;  %v1279_v62 = vrot.slane %v1271_v44, %v2216_v38 }
 0x175   : > { %v587_v37 = vrot.slane %v579_v29, %v2212_v34  ;;  %v746_v39 = vrot.slane %v738_v30, %v2212_v34  ;;  %v442_v41 = vrot.slane %v428_v31, %v2212_v34  ;;  %446 = vst.msk [vmem:[%s2274_s29] sm:$0x1] %vm445_vm6, %v435_v32 }
 0x176   : > { %962 = vrot.lane.b32.xlu1 %v959_v33, %s1970_s28  ;;  %v895_v42 = vpop.permute.xlu1 %894  ;;  %v1055_v43 = vpop.permute.xlu0 %1054  ;;  %v1431_v58 = vrot.slane %v1417_v7, %v2212_v34  ;;  %v1577_v59 = vcombine.high %v2270_v12, %v2270_v12  ;;  %v1584_v3 = vrot.slane %v2270_v12, %v2212_v34 }
 0x177   : > { %v588_v45 = vcombine.high %v587_v37, %v587_v37  ;;  %v595_v46 = vrot.slane %v587_v37, %v2212_v34  ;;  %v747_v47 = vcombine.high %v746_v39, %v746_v39  ;;  %v754_v48 = vrot.slane %v746_v39, %v2212_v34  ;;  %1120 = vrot.lane.b32.xlu0 %v1115_v40, %s1970_s28 }
 0x178   : > { %447 = vst.msk [vmem:[%s2274_s29 + $0x8] sm:$0x1] %vm445_vm6, %v442_v41  ;;  %v897_v49 = vsub.f32 %v2189_v14, %v895_v42  ;;  %v1057_v50 = vsub.f32 %v2192_v16, %v1055_v43  ;;  %v1439_v18 = vrot.slane %v1431_v58, %v2216_v38  ;;  %v1591_v19 = vrot.slane %v1577_v59, %v2212_v34 }
 0x179   : > { %v602_v53 = vrot.slane %v588_v45, %v2212_v34  ;;  %605 = vst.msk [vmem:[%s2274_s29 + $0x1] sm:$0x1] %vm445_vm6, %v595_v46  ;;  %v761_v54 = vrot.slane %v747_v47, %v2212_v34  ;;  %764 = vst.msk [vmem:[%s2274_s29 + $0x2] sm:$0x1] %vm445_vm6, %v754_v48  ;;  %v1595_v24 = vrot.slane %v1584_v3, %v2216_v38 }
 0x17a   : > { %v905_v14 = vrot.slane %v897_v49, %v2212_v34  ;;  %v1065_v16 = vrot.slane %v1057_v50, %v2212_v34  ;;  %1122 = vrot.lane.b32.xlu1 %v1119_v51, %s1970_s28  ;;  %v1215_v56 = vpop.permute.xlu1 %1214  ;;  %v1375_v57 = vpop.permute.xlu0 %1374  ;;  %v1599_v28 = vrot.slane %v1591_v19, %v2216_v38 }
 0x17b   : > { %606 = vst.msk [vmem:[%s2274_s29 + $0x9] sm:$0x1] %vm445_vm6, %v602_v53  ;;  %765 = vst.msk [vmem:[%s2274_s29 + $0xa] sm:$0x1] %vm445_vm6, %v761_v54  ;;  %v1217_v60 = vsub.f32 %v2195_v20, %v1215_v56  ;;  %v1377_v61 = vsub.f32 %v2198_v22, %v1375_v57  ;;  %1280 = vrot.lane.b32.xlu0 %v1275_v55, %s1970_s28  ;;  %v1435_v22 = vrot.slane %v1424_v52, %v2216_v38 }
 0x17c   : > { %v906_v63 = vcombine.high %v905_v14, %v905_v14  ;;  %v913_v0 = vrot.slane %v905_v14, %v2212_v34  ;;  %v1066_v1 = vcombine.high %v1065_v16, %v1065_v16  ;;  %v1073_v2 = vrot.slane %v1065_v16, %v2212_v34 }
 0x17d   : > { %v1225_v5 = vrot.slane %v1217_v60, %v2212_v34  ;;  %v1385_v20 = vrot.slane %v1377_v61, %v2212_v34 }
 0x17e   : > { %v920_v8 = vrot.slane %v906_v63, %v2212_v34  ;;  %923 = vst.msk [vmem:[%s2274_s29 + $0x3] sm:$0x1] %vm445_vm6, %v913_v0  ;;  %v1080_v9 = vrot.slane %v1066_v1, %v2212_v34  ;;  %1083 = vst.msk [vmem:[%s2274_s29 + $0x4] sm:$0x1] %vm445_vm6, %v1073_v2  ;;  %1282 = vrot.lane.b32.xlu1 %v1279_v62, %s1970_s28  ;;  %v1535_v10 = vpop.permute.xlu1 %1534 }
 0x17f   : > { %v1226_v11 = vcombine.high %v1225_v5, %v1225_v5  ;;  %v1233_v4 = vrot.slane %v1225_v5, %v2212_v34  ;;  %v1386_v13 = vcombine.high %v1385_v20, %v1385_v20  ;;  %v1393_v15 = vrot.slane %v1385_v20, %v2212_v34  ;;  %1440 = vrot.lane.b32.xlu0 %v1435_v22, %s1970_s28 }
 0x180   : > { %924 = vst.msk [vmem:[%s2274_s29 + $0xb] sm:$0x1] %vm445_vm6, %v920_v8  ;;  %1084 = vst.msk [vmem:[%s2274_s29 + $0xc] sm:$0x1] %vm445_vm6, %v1080_v9  ;;  %v1537_v17 = vsub.f32 %v2201_v25, %v1535_v10 }
 0x181   : > { %v1240_v21 = vrot.slane %v1226_v11, %v2212_v34  ;;  %1243 = vst.msk [vmem:[%s2274_s29 + $0x5] sm:$0x1] %vm445_vm6, %v1233_v4  ;;  %v1400_v23 = vrot.slane %v1386_v13, %v2212_v34  ;;  %1403 = vst.msk [vmem:[%s2274_s29 + $0x6] sm:$0x1] %vm445_vm6, %v1393_v15 }
 0x182   : > { %v1545_v26 = vrot.slane %v1537_v17, %v2212_v34  ;;  %1442 = vrot.lane.b32.xlu1 %v1439_v18, %s1970_s28 }
 0x183   : > { %1244 = vst.msk [vmem:[%s2274_s29 + $0xd] sm:$0x1] %vm445_vm6, %v1240_v21  ;;  %1404 = vst.msk [vmem:[%s2274_s29 + $0xe] sm:$0x1] %vm445_vm6, %v1400_v23  ;;  %1600 = vrot.lane.b32.xlu0 %v1595_v24, %s1970_s28 }
 0x184   : > { %v1546_v25 = vcombine.high %v1545_v26, %v1545_v26  ;;  %v1553_v27 = vrot.slane %v1545_v26, %v2212_v34 }
 0x186   : > { %v1560_v6 = vrot.slane %v1546_v25, %v2212_v34  ;;  %1563 = vst.msk [vmem:[%s2274_s29 + $0x7] sm:$0x1] %vm445_vm6, %v1553_v27  ;;  %1602 = vrot.lane.b32.xlu1 %v1599_v28, %s1970_s28 }
 0x188   : > { %1564 = vst.msk [vmem:[%s2274_s29 + $0xf] sm:$0x1] %vm445_vm6, %v1560_v6 }
 0x18d   : > { %v1651_v43 = vld [vmem:[%s2274_s29] sm:$0xff] (%p2031_p5) }
 0x18e   : > { %1652 = vst [vmem:[%s1620_s7] sm:$0xff] (%p2031_p5), %v1651_v43 }
 0x18f   : > { %v1653_v44 = vld [vmem:[%s2274_s29 + $0x8] sm:$0xff] (%p2031_p5) }
 0x190   : > { %1654 = vst [vmem:[%s1620_s7 + $0x28] sm:$0xff] (%p2031_p5), %v1653_v44 }
 0x1d9   : > { %v484_v29 = vpop.permute.xlu0 %483 }
 0x1da   : > { %489 = vst.msk [vmem:[%s2358_s30] sm:$0x1] %vm445_vm6, %v484_v29 }
 0x1dc   : > { %v486_v34 = vpop.permute.xlu1 %485 }
 0x1dd   : > { %490 = vst.msk [vmem:[%s2358_s30 + $0x8] sm:$0x1] %vm445_vm6, %v486_v34  ;;  %v643_v38 = vpop.permute.xlu0 %642 }
 0x1de   : > { %648 = vst.msk [vmem:[%s2358_s30 + $0x1] sm:$0x1] %vm445_vm6, %v643_v38 }
 0x1e0   : > { %v645_v30 = vpop.permute.xlu1 %644 }
 0x1e1   : > { %649 = vst.msk [vmem:[%s2358_s30 + $0x9] sm:$0x1] %vm445_vm6, %v645_v30  ;;  %v802_v31 = vpop.permute.xlu0 %801 }
 0x1e2   : > { %807 = vst.msk [vmem:[%s2358_s30 + $0x2] sm:$0x1] %vm445_vm6, %v802_v31 }
 0x1e4   : > { %v804_v32 = vpop.permute.xlu1 %803 }
 0x1e5   : > { %808 = vst.msk [vmem:[%s2358_s30 + $0xa] sm:$0x1] %vm445_vm6, %v804_v32  ;;  %v961_v33 = vpop.permute.xlu0 %960 }
 0x1e6   : > { %966 = vst.msk [vmem:[%s2358_s30 + $0x3] sm:$0x1] %vm445_vm6, %v961_v33 }
 0x1e8   : > { %v963_v35 = vpop.permute.xlu1 %962 }
 0x1e9   : > { %967 = vst.msk [vmem:[%s2358_s30 + $0xb] sm:$0x1] %vm445_vm6, %v963_v35  ;;  %v1121_v36 = vpop.permute.xlu0 %1120 }
 0x1ea   : > { %1126 = vst.msk [vmem:[%s2358_s30 + $0x4] sm:$0x1] %vm445_vm6, %v1121_v36 }
 0x1ec   : > { %v1123_v37 = vpop.permute.xlu1 %1122 }
 0x1ed   : > { %1127 = vst.msk [vmem:[%s2358_s30 + $0xc] sm:$0x1] %vm445_vm6, %v1123_v37  ;;  %v1281_v39 = vpop.permute.xlu0 %1280 }
 0x1ee   : > { %1286 = vst.msk [vmem:[%s2358_s30 + $0x5] sm:$0x1] %vm445_vm6, %v1281_v39 }
 0x1f0   : > { %v1283_v40 = vpop.permute.xlu1 %1282 }
 0x1f1   : > { %1287 = vst.msk [vmem:[%s2358_s30 + $0xd] sm:$0x1] %vm445_vm6, %v1283_v40  ;;  %v1441_v7 = vpop.permute.xlu0 %1440 }
 0x1f2   : > { %1446 = vst.msk [vmem:[%s2358_s30 + $0x6] sm:$0x1] %vm445_vm6, %v1441_v7 }
 0x1f4   : > { %v1443_v12 = vpop.permute.xlu1 %1442 }
 0x1f5   : > { %1447 = vst.msk [vmem:[%s2358_s30 + $0xe] sm:$0x1] %vm445_vm6, %v1443_v12  ;;  %v1601_v41 = vpop.permute.xlu0 %1600  ;;  %1618 = sbr.rel (!%p2031_p5) target bundleno = 506 (0x1fa), region = 112 }
 0x1f6   : > { %1606 = vst.msk [vmem:[%s2358_s30 + $0x7] sm:$0x1] %vm445_vm6, %v1601_v41 }
 0x1f8   : > { %v1603_v42 = vpop.permute.xlu1 %1602 }
 0x1f9   : > { %1607 = vst.msk [vmem:[%s2358_s30 + $0xf] sm:$0x1] %vm445_vm6, %v1603_v42 }
 0x1fa PF: > { %1660 = sbr.rel (!%p2031_p5) target bundleno = 514 (0x202), region = 150  ;;  %s1662_s10 = scalar_lea.vmem (%p2031_p5), %s2422_s4, %s2054_s13 }
 0x1fd   : > { %v1693_v45 = vld [vmem:[%s2358_s30] sm:$0xff] (%p2031_p5) }
 0x1fe   : > { %1694 = vst [vmem:[%s1662_s10] sm:$0xff] (%p2031_p5), %v1693_v45 }
 0x200   : > { %v1695_v46 = vld [vmem:[%s2358_s30 + $0x8] sm:$0xff] }
 0x201   : > { %1696 = vst [vmem:[%s1662_s10 + $0x28] sm:$0xff] %v1695_v46 }
 0x202 PF: > { %p12_p11 = scmp.ge.s32.totalorder %s2014_s19, 7   ;;  %s2425_s15 = smov %s1961_s16 }
 0x203   : > { %s2426_s16 = smov %s2025_s22  ;;  %s2427_s17 = smov %s2014_s19 }
 0x204   :  { %14 = sbr.rel (!%p12_p11) target bundleno = 2 (0x2), region = 249 }

// kernel: a_call__.3
= control target key start
LH: loop header
LB: loop body
LE: loop exit
PB: predicated region body
PF: predicated region fallthrough
CT: control target
= control target key end

     0   :  { %vm336_vm0 = vcmask 1043456   ;;  %vm143_vm1 = vcmask 31744   ;;  %s2134_s2 = inlined_call_operand.vmem [shape: f32[4,4], index: 2, kind: input, shape index: {}]   ;;  %s2135_s1 = inlined_call_operand.vmem [shape: f32[512,4], index: 1, kind: input, shape index: {}]   ;;  %s2136_s0 = inlined_call_operand.vmem [shape: f32[512,4], index: 0, kind: input, shape index: {}]   ;;  %s2137_s3 = inlined_call_operand.vmem [shape: f32[512,4], index: 3, kind: output, shape index: {}]  }
   0x1   :  { %v142_v0 = vld [vmem:[%s2134_s2] sm:$0xf]  ;;  %v1187_v3 = vld [vmem:[%s2135_s1 + $0x8] sm:$0xff]  ;;  %v1197_v5 = vld [vmem:[%s2135_s1 + $0x10] sm:$0xff] }
   0x2   :  { %v1177_v1 = vld [vmem:[%s2135_s1] sm:$0xff]  ;;  %1051 = vmatprep.subr.msk.mxu0 %vm336_vm0, %v142_v0  ;;  %1149 = vmatprep.subr.msk.mxu1 %vm336_vm0, %v142_v0  ;;  %v1192_v4 = vld [vmem:[%s2135_s1 + $0x108] sm:$0xff]  ;;  %v1202_v6 = vld [vmem:[%s2135_s1 + $0x110] sm:$0xff] }
   0x3   :  { %v1182_v2 = vld [vmem:[%s2135_s1 + $0x100] sm:$0xff]  ;;  %1052 = vmatpush3.msk.msra.mxu0 %vm336_vm0, %v142_v0  ;;  %1150 = vmatpush3.msk.msra.mxu1 %vm336_vm0, %v142_v0  ;;  %v1219_v7 = vld [vmem:[%s2135_s1 + $0x18] sm:$0xff]  ;;  %v1247_v11 = vld [vmem:[%s2135_s1 + $0x28] sm:$0xff] }
   0x4   :  { %1053 = vmatprep.mubr.msk.f32.mxu0 %vm143_vm1, %v1177_v1  ;;  %1101 = vmatprep.mubr.msk.f32.mxu1 %vm143_vm1, %v1182_v2  ;;  %v1224_v8 = vld [vmem:[%s2135_s1 + $0x118] sm:$0xff]  ;;  %v1229_v9 = vld [vmem:[%s2135_s1 + $0x20] sm:$0xff]  ;;  %v1252_v12 = vld [vmem:[%s2135_s1 + $0x128] sm:$0xff] }
   0x5   :  { %1054 = vmatmul.mubr.msk.f32.vlgmr.msra.gmra.mxu0 %vm143_vm1, %v1187_v3  ;;  %1102 = vmatmul.mubr.msk.f32.vlgmr.msra.gmra.mxu1 %vm143_vm1, %v1192_v4  ;;  %v1234_v10 = vld [vmem:[%s2135_s1 + $0x120] sm:$0xff]  ;;  %v1257_v13 = vld [vmem:[%s2135_s1 + $0x30] sm:$0xff]  ;;  %v1275_v15 = vld [vmem:[%s2135_s1 + $0x38] sm:$0xff] }
   0x6   :  { %1056 = vmatprep.mubr.msk.f32.mxu0 %vm143_vm1, %v1197_v5  ;;  %1104 = vmatprep.mubr.msk.f32.mxu1 %vm143_vm1, %v1202_v6  ;;  %v1262_v14 = vld [vmem:[%s2135_s1 + $0x130] sm:$0xff]  ;;  %v1280_v16 = vld [vmem:[%s2135_s1 + $0x138] sm:$0xff]  ;;  %v1285_v17 = vld [vmem:[%s2135_s1 + $0x40] sm:$0xff] }
   0x7   :  { %v1290_v18 = vld [vmem:[%s2135_s1 + $0x140] sm:$0xff]  ;;  %v1303_v19 = vld [vmem:[%s2135_s1 + $0x48] sm:$0xff]  ;;  %v1313_v21 = vld [vmem:[%s2135_s1 + $0x50] sm:$0xff] }
   0x8   :  { %v1308_v20 = vld [vmem:[%s2135_s1 + $0x148] sm:$0xff]  ;;  %v1318_v22 = vld [vmem:[%s2135_s1 + $0x150] sm:$0xff]  ;;  %v1331_v23 = vld [vmem:[%s2135_s1 + $0x58] sm:$0xff] }
   0x9   :  { %1057 = vmatmul.mubr.msk.f32.gmra.mxu0 %vm143_vm1, %v1219_v7  ;;  %1105 = vmatmul.mubr.msk.f32.gmra.mxu1 %vm143_vm1, %v1224_v8  ;;  %v1336_v24 = vld [vmem:[%s2135_s1 + $0x158] sm:$0xff]  ;;  %v1341_v25 = vld [vmem:[%s2135_s1 + $0x60] sm:$0xff]  ;;  %v1359_v27 = vld [vmem:[%s2135_s1 + $0x68] sm:$0xff] }
   0xa   :  { %1059 = vmatprep.mubr.msk.f32.mxu0 %vm143_vm1, %v1229_v9  ;;  %1107 = vmatprep.mubr.msk.f32.mxu1 %vm143_vm1, %v1234_v10  ;;  %v1346_v26 = vld [vmem:[%s2135_s1 + $0x160] sm:$0xff]  ;;  %v1364_v28 = vld [vmem:[%s2135_s1 + $0x168] sm:$0xff]  ;;  %v1369_v29 = vld [vmem:[%s2135_s1 + $0x70] sm:$0xff] }
   0xb   :  { %v1374_v30 = vld [vmem:[%s2135_s1 + $0x170] sm:$0xff]  ;;  %v1387_v31 = vld [vmem:[%s2135_s1 + $0x78] sm:$0xff]  ;;  %v1397_v33 = vld [vmem:[%s2135_s1 + $0x80] sm:$0xff] }
   0xc   :  { %v1392_v32 = vld [vmem:[%s2135_s1 + $0x178] sm:$0xff]  ;;  %v1402_v34 = vld [vmem:[%s2135_s1 + $0x180] sm:$0xff]  ;;  %v1415_v35 = vld [vmem:[%s2135_s1 + $0x88] sm:$0xff] }
   0xd   :  { %1060 = vmatmul.mubr.msk.f32.gmra.mxu0 %vm143_vm1, %v1247_v11  ;;  %1108 = vmatmul.mubr.msk.f32.gmra.mxu1 %vm143_vm1, %v1252_v12  ;;  %v1420_v36 = vld [vmem:[%s2135_s1 + $0x188] sm:$0xff]  ;;  %v1425_v37 = vld [vmem:[%s2135_s1 + $0x90] sm:$0xff]  ;;  %v1443_v39 = vld [vmem:[%s2135_s1 + $0x98] sm:$0xff] }
   0xe   :  { %1062 = vmatprep.mubr.msk.f32.mxu0 %vm143_vm1, %v1257_v13  ;;  %1110 = vmatprep.mubr.msk.f32.mxu1 %vm143_vm1, %v1262_v14  ;;  %v1430_v38 = vld [vmem:[%s2135_s1 + $0x190] sm:$0xff]  ;;  %v1448_v40 = vld [vmem:[%s2135_s1 + $0x198] sm:$0xff]  ;;  %v1453_v41 = vld [vmem:[%s2135_s1 + $0xa0] sm:$0xff] }
   0xf   :  { %v1458_v42 = vld [vmem:[%s2135_s1 + $0x1a0] sm:$0xff]  ;;  %v1471_v43 = vld [vmem:[%s2135_s1 + $0xa8] sm:$0xff]  ;;  %v1481_v45 = vld [vmem:[%s2135_s1 + $0xb0] sm:$0xff] }
  0x10   :  { %v1476_v44 = vld [vmem:[%s2135_s1 + $0x1a8] sm:$0xff]  ;;  %2156 = vst [vmem:[#allocation2_spill] sm:$0xff] %v1481_v45  ;;  %v1486_v46 = vld [vmem:[%s2135_s1 + $0x1b0] sm:$0xff]  ;;  %v1499_v47 = vld [vmem:[%s2135_s1 + $0xb8] sm:$0xff] }
  0x11   :  { %1063 = vmatmul.mubr.msk.f32.gmra.mxu0 %vm143_vm1, %v1275_v15  ;;  %1111 = vmatmul.mubr.msk.f32.gmra.mxu1 %vm143_vm1, %v1280_v16  ;;  %2157 = vst [vmem:[#allocation3_spill] sm:$0xff] %v1486_v46  ;;  %v1504_v48 = vld [vmem:[%s2135_s1 + $0x1b8] sm:$0xff]  ;;  %v1509_v49 = vld [vmem:[%s2135_s1 + $0xc0] sm:$0xff]  ;;  %v1527_v51 = vld [vmem:[%s2135_s1 + $0xc8] sm:$0xff] }
  0x12   :  { %1065 = vmatprep.mubr.msk.f32.mxu0 %vm143_vm1, %v1285_v17  ;;  %1113 = vmatprep.mubr.msk.f32.mxu1 %vm143_vm1, %v1290_v18  ;;  %2158 = vst [vmem:[#allocation4_spill] sm:$0xff] %v1509_v49  ;;  %v1514_v50 = vld [vmem:[%s2135_s1 + $0x1c0] sm:$0xff]  ;;  %2160 = vst [vmem:[#allocation6_spill] sm:$0xff] %v1527_v51  ;;  %v1532_v52 = vld [vmem:[%s2135_s1 + $0x1c8] sm:$0xff] }
  0x13   :  { %2159 = vst [vmem:[#allocation5_spill] sm:$0xff] %v1514_v50  ;;  %2161 = vst [vmem:[#allocation7_spill] sm:$0xff] %v1532_v52  ;;  %v1537_v53 = vld [vmem:[%s2135_s1 + $0xd0] sm:$0xff]  ;;  %v1555_v55 = vld [vmem:[%s2135_s1 + $0xd8] sm:$0xff] }
  0x14   :  { %2162 = vst [vmem:[#allocation8_spill] sm:$0xff] %v1537_v53  ;;  %v1542_v54 = vld [vmem:[%s2135_s1 + $0x1d0] sm:$0xff]  ;;  %2164 = vst [vmem:[#allocation10_spill] sm:$0xff] %v1555_v55  ;;  %v1560_v56 = vld [vmem:[%s2135_s1 + $0x1d8] sm:$0xff] }
  0x15   :  { %1066 = vmatmul.mubr.msk.f32.gmra.mxu0 %vm143_vm1, %v1303_v19  ;;  %1114 = vmatmul.mubr.msk.f32.gmra.mxu1 %vm143_vm1, %v1308_v20  ;;  %2163 = vst [vmem:[#allocation9_spill] sm:$0xff] %v1542_v54  ;;  %2165 = vst [vmem:[#allocation11_spill] sm:$0xff] %v1560_v56  ;;  %v1565_v57 = vld [vmem:[%s2135_s1 + $0xe0] sm:$0xff]  ;;  %v1583_v59 = vld [vmem:[%s2135_s1 + $0xe8] sm:$0xff] }
  0x16   :  { %1068 = vmatprep.mubr.msk.f32.mxu0 %vm143_vm1, %v1313_v21  ;;  %1116 = vmatprep.mubr.msk.f32.mxu1 %vm143_vm1, %v1318_v22  ;;  %2166 = vst [vmem:[#allocation12_spill] sm:$0xff] %v1565_v57  ;;  %v1570_v58 = vld [vmem:[%s2135_s1 + $0x1e0] sm:$0xff]  ;;  %2168 = vst [vmem:[#allocation14_spill] sm:$0xff] %v1583_v59  ;;  %v1588_v60 = vld [vmem:[%s2135_s1 + $0x1e8] sm:$0xff] }
  0x17   :  { %2167 = vst [vmem:[#allocation13_spill] sm:$0xff] %v1570_v58  ;;  %2169 = vst [vmem:[#allocation15_spill] sm:$0xff] %v1588_v60  ;;  %v1593_v61 = vld [vmem:[%s2135_s1 + $0xf0] sm:$0xff]  ;;  %v1611_v63 = vld [vmem:[%s2135_s1 + $0xf8] sm:$0xff] }
  0x18   :  { %2170 = vst [vmem:[#allocation16_spill] sm:$0xff] %v1593_v61  ;;  %v1598_v62 = vld [vmem:[%s2135_s1 + $0x1f0] sm:$0xff]  ;;  %2172 = vst [vmem:[#allocation18_spill] sm:$0xff] %v1611_v63  ;;  %v1616_v0 = vld [vmem:[%s2135_s1 + $0x1f8] sm:$0xff] }
  0x19   :  { %1069 = vmatmul.mubr.msk.f32.gmra.mxu0 %vm143_vm1, %v1331_v23  ;;  %1117 = vmatmul.mubr.msk.f32.gmra.mxu1 %vm143_vm1, %v1336_v24  ;;  %2171 = vst [vmem:[#allocation17_spill] sm:$0xff] %v1598_v62  ;;  %2173 = vst [vmem:[#allocation19_spill] sm:$0xff] %v1616_v0 }
  0x1a   :  { %1071 = vmatprep.mubr.msk.f32.mxu0 %vm143_vm1, %v1341_v25  ;;  %1119 = vmatprep.mubr.msk.f32.mxu1 %vm143_vm1, %v1346_v26 }
  0x1d   :  { %1072 = vmatmul.mubr.msk.f32.gmra.mxu0 %vm143_vm1, %v1359_v27  ;;  %1120 = vmatmul.mubr.msk.f32.gmra.mxu1 %vm143_vm1, %v1364_v28 }
  0x1e   :  { %1074 = vmatprep.mubr.msk.f32.mxu0 %vm143_vm1, %v1369_v29  ;;  %1122 = vmatprep.mubr.msk.f32.mxu1 %vm143_vm1, %v1374_v30 }
  0x21   :  { %1075 = vmatmul.mubr.msk.f32.gmra.mxu0 %vm143_vm1, %v1387_v31  ;;  %1123 = vmatmul.mubr.msk.f32.gmra.mxu1 %vm143_vm1, %v1392_v32 }
  0x22   :  { %1077 = vmatprep.mubr.msk.f32.mxu0 %vm143_vm1, %v1397_v33  ;;  %1125 = vmatprep.mubr.msk.f32.mxu1 %vm143_vm1, %v1402_v34 }
  0x25   :  { %1078 = vmatmul.mubr.msk.f32.gmra.mxu0 %vm143_vm1, %v1415_v35  ;;  %1126 = vmatmul.mubr.msk.f32.gmra.mxu1 %vm143_vm1, %v1420_v36 }
  0x26   :  { %1080 = vmatprep.mubr.msk.f32.mxu0 %vm143_vm1, %v1425_v37  ;;  %1128 = vmatprep.mubr.msk.f32.mxu1 %vm143_vm1, %v1430_v38 }
  0x29   :  { %1081 = vmatmul.mubr.msk.f32.gmra.mxu0 %vm143_vm1, %v1443_v39  ;;  %1129 = vmatmul.mubr.msk.f32.gmra.mxu1 %vm143_vm1, %v1448_v40 }
  0x2a   :  { %1083 = vmatprep.mubr.msk.f32.mxu0 %vm143_vm1, %v1453_v41  ;;  %1131 = vmatprep.mubr.msk.f32.mxu1 %vm143_vm1, %v1458_v42 }
  0x2d   :  { %1084 = vmatmul.mubr.msk.f32.gmra.mxu0 %vm143_vm1, %v1471_v43  ;;  %1132 = vmatmul.mubr.msk.f32.gmra.mxu1 %vm143_vm1, %v1476_v44 }
  0x2e   :  { %1086 = vmatprep.mubr.msk.f32.mxu0 %vm143_vm1, %v1481_v45  ;;  %1134 = vmatprep.mubr.msk.f32.mxu1 %vm143_vm1, %v1486_v46 }
  0x31   :  { %1087 = vmatmul.mubr.msk.f32.gmra.mxu0 %vm143_vm1, %v1499_v47  ;;  %1135 = vmatmul.mubr.msk.f32.gmra.mxu1 %vm143_vm1, %v1504_v48 }
  0x32   :  { %1089 = vmatprep.mubr.msk.f32.mxu0 %vm143_vm1, %v1509_v49  ;;  %1137 = vmatprep.mubr.msk.f32.mxu1 %vm143_vm1, %v1514_v50 }
  0x35   :  { %1090 = vmatmul.mubr.msk.f32.gmra.mxu0 %vm143_vm1, %v1527_v51  ;;  %1138 = vmatmul.mubr.msk.f32.gmra.mxu1 %vm143_vm1, %v1532_v52 }
  0x36   :  { %1092 = vmatprep.mubr.msk.f32.mxu0 %vm143_vm1, %v1537_v53  ;;  %1140 = vmatprep.mubr.msk.f32.mxu1 %vm143_vm1, %v1542_v54 }
  0x39   :  { %1093 = vmatmul.mubr.msk.f32.gmra.mxu0 %vm143_vm1, %v1555_v55  ;;  %1141 = vmatmul.mubr.msk.f32.gmra.mxu1 %vm143_vm1, %v1560_v56  ;;  %v17_v56 = vld [vmem:[%s2136_s0 + $0x18] sm:$0xff] }
  0x3a   :  { %1095 = vmatprep.mubr.msk.f32.mxu0 %vm143_vm1, %v1565_v57  ;;  %1143 = vmatprep.mubr.msk.f32.mxu1 %vm143_vm1, %v1570_v58  ;;  %v49_v55 = vld [vmem:[%s2136_s0 + $0x118] sm:$0xff] }
  0x3d   :  { %1096 = vmatmul.mubr.msk.f32.gmra.mxu0 %vm143_vm1, %v1583_v59  ;;  %1144 = vmatmul.mubr.msk.f32.gmra.mxu1 %vm143_vm1, %v1588_v60  ;;  %v14_v60 = vld [vmem:[%s2136_s0] sm:$0xff] }
  0x3e   :  { %1098 = vmatprep.mubr.msk.f32.mxu0 %vm143_vm1, %v1593_v61  ;;  %1146 = vmatprep.mubr.msk.f32.mxu1 %vm143_vm1, %v1598_v62  ;;  %v15_v62 = vld [vmem:[%s2136_s0 + $0x8] sm:$0xff] }
  0x3f   :  { %v47_v61 = vld [vmem:[%s2136_s0 + $0x108] sm:$0xff] }
  0x41   :  { %1099 = vmatmul.mubr.msk.f32.gmra.mxu0 %vm143_vm1, %v1611_v63  ;;  %1147 = vmatmul.mubr.msk.f32.gmra.mxu1 %vm143_vm1, %v1616_v0  ;;  %v46_v63 = vld [vmem:[%s2136_s0 + $0x100] sm:$0xff] }
  0xc5   :  { %v1055_v58 = vpop.f32.mrf.mxu0  ;;  %v1103_v57 = vpop.f32.mrf.mxu1 }
  0xc6   :  { %v726_v59 = vadd.f32 %v1055_v58, %v15_v62  ;;  %v758_v0 = vadd.f32 %v1103_v57, %v47_v61  ;;  %v16_v57 = vld [vmem:[%s2136_s0 + $0x10] sm:$0xff]  ;;  %v19_v61 = vld [vmem:[%s2136_s0 + $0x28] sm:$0xff] }
  0xc7   :  { %v406_v54 = vpop.f32.mrf.mxu0  ;;  %v566_v53 = vpop.f32.mrf.mxu1  ;;  %v48_v58 = vld [vmem:[%s2136_s0 + $0x110] sm:$0xff] }
  0xc8   :  { %v790_v50 = vadd.f32 %v726_v59, %v1187_v3  ;;  %v822_v49 = vadd.f32 %v758_v0, %v1192_v4  ;;  %v725_v52 = vadd.f32 %v406_v54, %v14_v60  ;;  %v757_v51 = vadd.f32 %v566_v53, %v46_v63 }
  0xc9   :  { %v1058_v46 = vpop.f32.mrf.mxu0  ;;  %v1106_v45 = vpop.f32.mrf.mxu1 }
  0xca   :  { %854 = vst.msk [vmem:[%s2137_s3 + $0x8] sm:$0xff] %vm143_vm1, %v790_v50  ;;  %886 = vst.msk [vmem:[%s2137_s3 + $0x108] sm:$0xff] %vm143_vm1, %v822_v49  ;;  %v789_v3 = vadd.f32 %v725_v52, %v1177_v1  ;;  %v821_v4 = vadd.f32 %v757_v51, %v1182_v2  ;;  %v728_v53 = vadd.f32 %v1058_v46, %v17_v56  ;;  %v51_v50 = vld [vmem:[%s2136_s0 + $0x128] sm:$0xff]  ;;  %v18_v52 = vld [vmem:[%s2136_s0 + $0x20] sm:$0xff] }
  0xcb   :  { %v760_v54 = vadd.f32 %v1106_v45, %v49_v55  ;;  %v416_v59 = vpop.f32.mrf.mxu0  ;;  %v576_v60 = vpop.f32.mrf.mxu1  ;;  %v50_v55 = vld [vmem:[%s2136_s0 + $0x120] sm:$0xff] }
  0xcc   :  { %853 = vst.msk [vmem:[%s2137_s3] sm:$0xff] %vm143_vm1, %v789_v3  ;;  %885 = vst.msk [vmem:[%s2137_s3 + $0x100] sm:$0xff] %vm143_vm1, %v821_v4  ;;  %v792_v1 = vadd.f32 %v728_v53, %v1219_v7  ;;  %v727_v45 = vadd.f32 %v416_v59, %v16_v57  ;;  %v759_v46 = vadd.f32 %v576_v60, %v48_v58  ;;  %v21_v57 = vld [vmem:[%s2136_s0 + $0x38] sm:$0xff]  ;;  %v20_v59 = vld [vmem:[%s2136_s0 + $0x30] sm:$0xff] }
  0xcd   :  { %v824_v2 = vadd.f32 %v760_v54, %v1224_v8  ;;  %v1061_v49 = vpop.f32.mrf.mxu0  ;;  %v1109_v51 = vpop.f32.mrf.mxu1  ;;  %v53_v58 = vld [vmem:[%s2136_s0 + $0x138] sm:$0xff]  ;;  %v52_v60 = vld [vmem:[%s2136_s0 + $0x130] sm:$0xff] }
  0xce   :  { %856 = vst.msk [vmem:[%s2137_s3 + $0x18] sm:$0xff] %vm143_vm1, %v792_v1  ;;  %v791_v7 = vadd.f32 %v727_v45, %v1197_v5  ;;  %v823_v8 = vadd.f32 %v759_v46, %v1202_v6  ;;  %v730_v56 = vadd.f32 %v1061_v49, %v19_v61  ;;  %v762_v62 = vadd.f32 %v1109_v51, %v51_v50  ;;  %v23_v45 = vld [vmem:[%s2136_s0 + $0x48] sm:$0xff] }
  0xcf   :  { %888 = vst.msk [vmem:[%s2137_s3 + $0x118] sm:$0xff] %vm143_vm1, %v824_v2  ;;  %v426_v63 = vpop.f32.mrf.mxu0  ;;  %v586_v0 = vpop.f32.mrf.mxu1  ;;  %v55_v46 = vld [vmem:[%s2136_s0 + $0x148] sm:$0xff] }
  0xd0   :  { %855 = vst.msk [vmem:[%s2137_s3 + $0x10] sm:$0xff] %vm143_vm1, %v791_v7  ;;  %887 = vst.msk [vmem:[%s2137_s3 + $0x110] sm:$0xff] %vm143_vm1, %v823_v8  ;;  %v794_v5 = vadd.f32 %v730_v56, %v1247_v11  ;;  %v826_v6 = vadd.f32 %v762_v62, %v1252_v12  ;;  %v729_v3 = vadd.f32 %v426_v63, %v18_v52  ;;  %v22_v7 = vld [vmem:[%s2136_s0 + $0x40] sm:$0xff] }
  0xd1   :  { %v761_v4 = vadd.f32 %v586_v0, %v50_v55  ;;  %v1064_v53 = vpop.f32.mrf.mxu0  ;;  %v1112_v54 = vpop.f32.mrf.mxu1  ;;  %v54_v8 = vld [vmem:[%s2136_s0 + $0x140] sm:$0xff] }
  0xd2   :  { %858 = vst.msk [vmem:[%s2137_s3 + $0x28] sm:$0xff] %vm143_vm1, %v794_v5  ;;  %890 = vst.msk [vmem:[%s2137_s3 + $0x128] sm:$0xff] %vm143_vm1, %v826_v6  ;;  %v793_v11 = vadd.f32 %v729_v3, %v1229_v9  ;;  %v732_v61 = vadd.f32 %v1064_v53, %v21_v57  ;;  %v764_v50 = vadd.f32 %v1112_v54, %v53_v58  ;;  %v25_v57 = vld [vmem:[%s2136_s0 + $0x58] sm:$0xff]  ;;  %v24_v53 = vld [vmem:[%s2136_s0 + $0x50] sm:$0xff] }
  0xd3   :  { %v825_v12 = vadd.f32 %v761_v4, %v1234_v10  ;;  %v436_v1 = vpop.f32.mrf.mxu0  ;;  %v596_v2 = vpop.f32.mrf.mxu1  ;;  %v57_v58 = vld [vmem:[%s2136_s0 + $0x158] sm:$0xff]  ;;  %v56_v54 = vld [vmem:[%s2136_s0 + $0x150] sm:$0xff] }
  0xd4   :  { %857 = vst.msk [vmem:[%s2137_s3 + $0x20] sm:$0xff] %vm143_vm1, %v793_v11  ;;  %v796_v9 = vadd.f32 %v732_v61, %v1275_v15  ;;  %v828_v10 = vadd.f32 %v764_v50, %v1280_v16  ;;  %v731_v49 = vadd.f32 %v436_v1, %v20_v59  ;;  %v763_v51 = vadd.f32 %v596_v2, %v52_v60  ;;  %v27_v61 = vld [vmem:[%s2136_s0 + $0x68] sm:$0xff] }
  0xd5   :  { %889 = vst.msk [vmem:[%s2137_s3 + $0x120] sm:$0xff] %vm143_vm1, %v825_v12  ;;  %v1067_v52 = vpop.f32.mrf.mxu0  ;;  %v1115_v55 = vpop.f32.mrf.mxu1  ;;  %v59_v50 = vld [vmem:[%s2136_s0 + $0x168] sm:$0xff] }
  0xd6   :  { %860 = vst.msk [vmem:[%s2137_s3 + $0x38] sm:$0xff] %vm143_vm1, %v796_v9  ;;  %892 = vst.msk [vmem:[%s2137_s3 + $0x138] sm:$0xff] %vm143_vm1, %v828_v10  ;;  %v795_v15 = vadd.f32 %v731_v49, %v1257_v13  ;;  %v827_v16 = vadd.f32 %v763_v51, %v1262_v14  ;;  %v734_v56 = vadd.f32 %v1067_v52, %v23_v45  ;;  %v26_v9 = vld [vmem:[%s2136_s0 + $0x60] sm:$0xff] }
  0xd7   :  { %v766_v62 = vadd.f32 %v1115_v55, %v55_v46  ;;  %v446_v63 = vpop.f32.mrf.mxu0  ;;  %v606_v0 = vpop.f32.mrf.mxu1  ;;  %v58_v10 = vld [vmem:[%s2136_s0 + $0x160] sm:$0xff] }
  0xd8   :  { %859 = vst.msk [vmem:[%s2137_s3 + $0x30] sm:$0xff] %vm143_vm1, %v795_v15  ;;  %891 = vst.msk [vmem:[%s2137_s3 + $0x130] sm:$0xff] %vm143_vm1, %v827_v16  ;;  %v798_v13 = vadd.f32 %v734_v56, %v1303_v19  ;;  %v733_v5 = vadd.f32 %v446_v63, %v22_v7  ;;  %v765_v6 = vadd.f32 %v606_v0, %v54_v8  ;;  %v29_v7 = vld [vmem:[%s2136_s0 + $0x78] sm:$0xff]  ;;  %v28_v63 = vld [vmem:[%s2136_s0 + $0x70] sm:$0xff] }
  0xd9   :  { %v830_v14 = vadd.f32 %v766_v62, %v1308_v20  ;;  %v1070_v3 = vpop.f32.mrf.mxu0  ;;  %v1118_v4 = vpop.f32.mrf.mxu1  ;;  %v61_v8 = vld [vmem:[%s2136_s0 + $0x178] sm:$0xff]  ;;  %v60_v0 = vld [vmem:[%s2136_s0 + $0x170] sm:$0xff] }
  0xda   :  { %862 = vst.msk [vmem:[%s2137_s3 + $0x48] sm:$0xff] %vm143_vm1, %v798_v13  ;;  %v797_v19 = vadd.f32 %v733_v5, %v1285_v17  ;;  %v829_v20 = vadd.f32 %v765_v6, %v1290_v18  ;;  %v736_v59 = vadd.f32 %v1070_v3, %v25_v57  ;;  %v768_v60 = vadd.f32 %v1118_v4, %v57_v58  ;;  %v31_v5 = vld [vmem:[%s2136_s0 + $0x88] sm:$0xff] }
  0xdb   :  { %894 = vst.msk [vmem:[%s2137_s3 + $0x148] sm:$0xff] %vm143_vm1, %v830_v14  ;;  %v456_v11 = vpop.f32.mrf.mxu0  ;;  %v616_v12 = vpop.f32.mrf.mxu1  ;;  %v63_v6 = vld [vmem:[%s2136_s0 + $0x188] sm:$0xff] }
  0xdc   :  { %861 = vst.msk [vmem:[%s2137_s3 + $0x40] sm:$0xff] %vm143_vm1, %v797_v19  ;;  %893 = vst.msk [vmem:[%s2137_s3 + $0x140] sm:$0xff] %vm143_vm1, %v829_v20  ;;  %v800_v17 = vadd.f32 %v736_v59, %v1331_v23  ;;  %v832_v18 = vadd.f32 %v768_v60, %v1336_v24  ;;  %v735_v1 = vadd.f32 %v456_v11, %v24_v53  ;;  %v30_v19 = vld [vmem:[%s2136_s0 + $0x80] sm:$0xff] }
  0xdd   :  { %v767_v2 = vadd.f32 %v616_v12, %v56_v54  ;;  %v1073_v45 = vpop.f32.mrf.mxu0  ;;  %v1121_v46 = vpop.f32.mrf.mxu1  ;;  %v62_v20 = vld [vmem:[%s2136_s0 + $0x180] sm:$0xff] }
  0xde   :  { %864 = vst.msk [vmem:[%s2137_s3 + $0x58] sm:$0xff] %vm143_vm1, %v800_v17  ;;  %896 = vst.msk [vmem:[%s2137_s3 + $0x158] sm:$0xff] %vm143_vm1, %v832_v18  ;;  %v799_v23 = vadd.f32 %v735_v1, %v1313_v21  ;;  %v738_v49 = vadd.f32 %v1073_v45, %v27_v61  ;;  %v770_v51 = vadd.f32 %v1121_v46, %v59_v50  ;;  %v33_v61 = vld [vmem:[%s2136_s0 + $0x98] sm:$0xff]  ;;  %v32_v45 = vld [vmem:[%s2136_s0 + $0x90] sm:$0xff] }
  0xdf   :  { %v831_v24 = vadd.f32 %v767_v2, %v1318_v22  ;;  %v466_v52 = vpop.f32.mrf.mxu0  ;;  %v626_v55 = vpop.f32.mrf.mxu1  ;;  %v65_v50 = vld [vmem:[%s2136_s0 + $0x198] sm:$0xff]  ;;  %v64_v46 = vld [vmem:[%s2136_s0 + $0x190] sm:$0xff] }
  0xe0   :  { %863 = vst.msk [vmem:[%s2137_s3 + $0x50] sm:$0xff] %vm143_vm1, %v799_v23  ;;  %v802_v21 = vadd.f32 %v738_v49, %v1359_v27  ;;  %v834_v22 = vadd.f32 %v770_v51, %v1364_v28  ;;  %v737_v15 = vadd.f32 %v466_v52, %v26_v9  ;;  %v769_v16 = vadd.f32 %v626_v55, %v58_v10  ;;  %v35_v49 = vld [vmem:[%s2136_s0 + $0xa8] sm:$0xff] }
  0xe1   :  { %895 = vst.msk [vmem:[%s2137_s3 + $0x150] sm:$0xff] %vm143_vm1, %v831_v24  ;;  %v1076_v56 = vpop.f32.mrf.mxu0  ;;  %v1124_v62 = vpop.f32.mrf.mxu1  ;;  %v67_v51 = vld [vmem:[%s2136_s0 + $0x1a8] sm:$0xff] }
  0xe2   :  { %866 = vst.msk [vmem:[%s2137_s3 + $0x68] sm:$0xff] %vm143_vm1, %v802_v21  ;;  %898 = vst.msk [vmem:[%s2137_s3 + $0x168] sm:$0xff] %vm143_vm1, %v834_v22  ;;  %v801_v27 = vadd.f32 %v737_v15, %v1341_v25  ;;  %v833_v28 = vadd.f32 %v769_v16, %v1346_v26  ;;  %v740_v57 = vadd.f32 %v1076_v56, %v29_v7  ;;  %v34_v21 = vld [vmem:[%s2136_s0 + $0xa0] sm:$0xff] }
  0xe3   :  { %v772_v58 = vadd.f32 %v1124_v62, %v61_v8  ;;  %v476_v13 = vpop.f32.mrf.mxu0  ;;  %v636_v14 = vpop.f32.mrf.mxu1  ;;  %v66_v22 = vld [vmem:[%s2136_s0 + $0x1a0] sm:$0xff] }
  0xe4   :  { %865 = vst.msk [vmem:[%s2137_s3 + $0x60] sm:$0xff] %vm143_vm1, %v801_v27  ;;  %897 = vst.msk [vmem:[%s2137_s3 + $0x160] sm:$0xff] %vm143_vm1, %v833_v28  ;;  %v804_v25 = vadd.f32 %v740_v57, %v1387_v31  ;;  %v739_v3 = vadd.f32 %v476_v13, %v28_v63  ;;  %v771_v4 = vadd.f32 %v636_v14, %v60_v0  ;;  %v37_v63 = vld [vmem:[%s2136_s0 + $0xb8] sm:$0xff]  ;;  %v36_v13 = vld [vmem:[%s2136_s0 + $0xb0] sm:$0xff] }
  0xe5   :  { %v836_v26 = vadd.f32 %v772_v58, %v1392_v32  ;;  %v1079_v53 = vpop.f32.mrf.mxu0  ;;  %v1127_v54 = vpop.f32.mrf.mxu1  ;;  %v69_v0 = vld [vmem:[%s2136_s0 + $0x1b8] sm:$0xff]  ;;  %v68_v14 = vld [vmem:[%s2136_s0 + $0x1b0] sm:$0xff] }
  0xe6   :  { %868 = vst.msk [vmem:[%s2137_s3 + $0x78] sm:$0xff] %vm143_vm1, %v804_v25  ;;  %v803_v31 = vadd.f32 %v739_v3, %v1369_v29  ;;  %v835_v32 = vadd.f32 %v771_v4, %v1374_v30  ;;  %v742_v59 = vadd.f32 %v1079_v53, %v31_v5  ;;  %v774_v60 = vadd.f32 %v1127_v54, %v63_v6  ;;  %v39_v3 = vld [vmem:[%s2136_s0 + $0xc8] sm:$0xff] }
  0xe7   :  { %900 = vst.msk [vmem:[%s2137_s3 + $0x178] sm:$0xff] %vm143_vm1, %v836_v26  ;;  %v486_v11 = vpop.f32.mrf.mxu0  ;;  %v646_v12 = vpop.f32.mrf.mxu1  ;;  %v71_v4 = vld [vmem:[%s2136_s0 + $0x1c8] sm:$0xff] }
  0xe8   :  { %867 = vst.msk [vmem:[%s2137_s3 + $0x70] sm:$0xff] %vm143_vm1, %v803_v31  ;;  %899 = vst.msk [vmem:[%s2137_s3 + $0x170] sm:$0xff] %vm143_vm1, %v835_v32  ;;  %v806_v29 = vadd.f32 %v742_v59, %v1415_v35  ;;  %v838_v30 = vadd.f32 %v774_v60, %v1420_v36  ;;  %v741_v17 = vadd.f32 %v486_v11, %v30_v19  ;;  %v38_v31 = vld [vmem:[%s2136_s0 + $0xc0] sm:$0xff]  ;;  %v2175_v59 = vld [vmem:[#allocation3_spill] sm:$0xff] }
  0xe9   :  { %v773_v18 = vadd.f32 %v646_v12, %v62_v20  ;;  %v1082_v1 = vpop.f32.mrf.mxu0  ;;  %v1130_v2 = vpop.f32.mrf.mxu1  ;;  %v70_v32 = vld [vmem:[%s2136_s0 + $0x1c0] sm:$0xff] }
  0xea   :  { %870 = vst.msk [vmem:[%s2137_s3 + $0x88] sm:$0xff] %vm143_vm1, %v806_v29  ;;  %902 = vst.msk [vmem:[%s2137_s3 + $0x188] sm:$0xff] %vm143_vm1, %v838_v30  ;;  %v805_v35 = vadd.f32 %v741_v17, %v1397_v33  ;;  %v744_v9 = vadd.f32 %v1082_v1, %v33_v61  ;;  %v776_v10 = vadd.f32 %v1130_v2, %v65_v50  ;;  %v41_v29 = vld [vmem:[%s2136_s0 + $0xd8] sm:$0xff]  ;;  %v2176_v17 = vld [vmem:[#allocation6_spill] sm:$0xff] }
  0xeb   :  { %v837_v36 = vadd.f32 %v773_v18, %v1402_v34  ;;  %v496_v23 = vpop.f32.mrf.mxu0  ;;  %v656_v24 = vpop.f32.mrf.mxu1  ;;  %v73_v30 = vld [vmem:[%s2136_s0 + $0x1d8] sm:$0xff]  ;;  %v2177_v1 = vld [vmem:[#allocation7_spill] sm:$0xff] }
  0xec   :  { %869 = vst.msk [vmem:[%s2137_s3 + $0x80] sm:$0xff] %vm143_vm1, %v805_v35  ;;  %v808_v33 = vadd.f32 %v744_v9, %v1443_v39  ;;  %v840_v34 = vadd.f32 %v776_v10, %v1448_v40  ;;  %v743_v52 = vadd.f32 %v496_v23, %v32_v45  ;;  %v775_v55 = vadd.f32 %v656_v24, %v64_v46  ;;  %v40_v9 = vld [vmem:[%s2136_s0 + $0xd0] sm:$0xff] }
  0xed   :  { %901 = vst.msk [vmem:[%s2137_s3 + $0x180] sm:$0xff] %vm143_vm1, %v837_v36  ;;  %v1085_v7 = vpop.f32.mrf.mxu0  ;;  %v1133_v8 = vpop.f32.mrf.mxu1  ;;  %v72_v10 = vld [vmem:[%s2136_s0 + $0x1d0] sm:$0xff] }
  0xee   :  { %872 = vst.msk [vmem:[%s2137_s3 + $0x98] sm:$0xff] %vm143_vm1, %v808_v33  ;;  %904 = vst.msk [vmem:[%s2137_s3 + $0x198] sm:$0xff] %vm143_vm1, %v840_v34  ;;  %v807_v39 = vadd.f32 %v743_v52, %v1425_v37  ;;  %v839_v40 = vadd.f32 %v775_v55, %v1430_v38  ;;  %v746_v15 = vadd.f32 %v1085_v7, %v35_v49  ;;  %v2178_v23 = vld [vmem:[#allocation4_spill] sm:$0xff]  ;;  %v2179_v49 = vld [vmem:[#allocation5_spill] sm:$0xff] }
  0xef   :  { %v778_v16 = vadd.f32 %v1133_v8, %v67_v51  ;;  %v506_v56 = vpop.f32.mrf.mxu0  ;;  %v666_v62 = vpop.f32.mrf.mxu1  ;;  %v43_v7 = vld [vmem:[%s2136_s0 + $0xe8] sm:$0xff] }
  0xf0   :  { %871 = vst.msk [vmem:[%s2137_s3 + $0x90] sm:$0xff] %vm143_vm1, %v807_v39  ;;  %903 = vst.msk [vmem:[%s2137_s3 + $0x190] sm:$0xff] %vm143_vm1, %v839_v40  ;;  %v810_v37 = vadd.f32 %v746_v15, %v1471_v43  ;;  %v745_v27 = vadd.f32 %v506_v56, %v34_v21  ;;  %v777_v28 = vadd.f32 %v666_v62, %v66_v22  ;;  %v75_v8 = vld [vmem:[%s2136_s0 + $0x1e8] sm:$0xff]  ;;  %v2180_v21 = vld [vmem:[#allocation10_spill] sm:$0xff] }
  0xf1   :  { %v842_v38 = vadd.f32 %v778_v16, %v1476_v44  ;;  %v1088_v57 = vpop.f32.mrf.mxu0  ;;  %v1136_v58 = vpop.f32.mrf.mxu1  ;;  %v2181_v39 = vld [vmem:[#allocation11_spill] sm:$0xff] }
  0xf2   :  { %874 = vst.msk [vmem:[%s2137_s3 + $0xa8] sm:$0xff] %vm143_vm1, %v810_v37  ;;  %v809_v43 = vadd.f32 %v745_v27, %v1453_v41  ;;  %v841_v44 = vadd.f32 %v777_v28, %v1458_v42  ;;  %v748_v5 = vadd.f32 %v1088_v57, %v37_v63  ;;  %v780_v6 = vadd.f32 %v1136_v58, %v69_v0  ;;  %v42_v63 = vld [vmem:[%s2136_s0 + $0xe0] sm:$0xff]  ;;  %v2182_v37 = vld [vmem:[#allocation8_spill] sm:$0xff]  ;;  %v2183_v27 = vld [vmem:[#allocation9_spill] sm:$0xff] }
  0xf3   :  { %906 = vst.msk [vmem:[%s2137_s3 + $0x1a8] sm:$0xff] %vm143_vm1, %v842_v38  ;;  %v516_v25 = vpop.f32.mrf.mxu0  ;;  %v676_v26 = vpop.f32.mrf.mxu1  ;;  %v74_v0 = vld [vmem:[%s2136_s0 + $0x1e0] sm:$0xff] }
  0xf4   :  { %873 = vst.msk [vmem:[%s2137_s3 + $0xa0] sm:$0xff] %vm143_vm1, %v809_v43  ;;  %905 = vst.msk [vmem:[%s2137_s3 + $0x1a0] sm:$0xff] %vm143_vm1, %v841_v44  ;;  %v812_v41 = vadd.f32 %v748_v5, %v1499_v47  ;;  %v844_v42 = vadd.f32 %v780_v6, %v1504_v48  ;;  %v747_v53 = vadd.f32 %v516_v25, %v36_v13  ;;  %v2174_v47 = vld [vmem:[#allocation2_spill] sm:$0xff]  ;;  %v45_v43 = vld [vmem:[%s2136_s0 + $0xf8] sm:$0xff] }
  0xf5   :  { %v779_v54 = vadd.f32 %v676_v26, %v68_v14  ;;  %v1091_v19 = vpop.f32.mrf.mxu0  ;;  %v1139_v20 = vpop.f32.mrf.mxu1  ;;  %v77_v44 = vld [vmem:[%s2136_s0 + $0x1f8] sm:$0xff]  ;;  %v2184_v5 = vld [vmem:[#allocation14_spill] sm:$0xff]  ;;  %v2185_v25 = vld [vmem:[#allocation15_spill] sm:$0xff] }
  0xf6   :  { %876 = vst.msk [vmem:[%s2137_s3 + $0xb8] sm:$0xff] %vm143_vm1, %v812_v41  ;;  %908 = vst.msk [vmem:[%s2137_s3 + $0x1b8] sm:$0xff] %vm143_vm1, %v844_v42  ;;  %v811_v48 = vadd.f32 %v747_v53, %v2174_v47  ;;  %v750_v11 = vadd.f32 %v1091_v19, %v39_v3  ;;  %v782_v12 = vadd.f32 %v1139_v20, %v71_v4  ;;  %v44_v53 = vld [vmem:[%s2136_s0 + $0xf0] sm:$0xff] }
  0xf7   :  { %v843_v60 = vadd.f32 %v779_v54, %v2175_v59  ;;  %v526_v61 = vpop.f32.mrf.mxu0  ;;  %v686_v50 = vpop.f32.mrf.mxu1  ;;  %v76_v54 = vld [vmem:[%s2136_s0 + $0x1f0] sm:$0xff] }
  0xf8   :  { %875 = vst.msk [vmem:[%s2137_s3 + $0xb0] sm:$0xff] %vm143_vm1, %v811_v48  ;;  %v814_v18 = vadd.f32 %v750_v11, %v2176_v17  ;;  %v846_v2 = vadd.f32 %v782_v12, %v2177_v1  ;;  %v749_v45 = vadd.f32 %v526_v61, %v38_v31  ;;  %v781_v46 = vadd.f32 %v686_v50, %v70_v32  ;;  %v2186_v19 = vld [vmem:[#allocation12_spill] sm:$0xff]  ;;  %v2187_v31 = vld [vmem:[#allocation13_spill] sm:$0xff]  ;;  %v2188_v11 = vld [vmem:[#allocation18_spill] sm:$0xff] }
  0xf9   :  { %907 = vst.msk [vmem:[%s2137_s3 + $0x1b0] sm:$0xff] %vm143_vm1, %v843_v60  ;;  %v1094_v35 = vpop.f32.mrf.mxu0  ;;  %v1142_v36 = vpop.f32.mrf.mxu1  ;;  %v2189_v61 = vld [vmem:[#allocation19_spill] sm:$0xff]  ;;  %v2190_v17 = vld [vmem:[#allocation16_spill] sm:$0xff]  ;;  %v2191_v1 = vld [vmem:[#allocation17_spill] sm:$0xff] }
  0xfa   :  { %878 = vst.msk [vmem:[%s2137_s3 + $0xc8] sm:$0xff] %vm143_vm1, %v814_v18  ;;  %910 = vst.msk [vmem:[%s2137_s3 + $0x1c8] sm:$0xff] %vm143_vm1, %v846_v2  ;;  %v813_v24 = vadd.f32 %v749_v45, %v2178_v23  ;;  %v845_v51 = vadd.f32 %v781_v46, %v2179_v49  ;;  %v752_v33 = vadd.f32 %v1094_v35, %v41_v29 }
  0xfb   :  { %v784_v34 = vadd.f32 %v1142_v36, %v73_v30  ;;  %v536_v52 = vpop.f32.mrf.mxu0  ;;  %v696_v55 = vpop.f32.mrf.mxu1 }
  0xfc   :  { %877 = vst.msk [vmem:[%s2137_s3 + $0xc0] sm:$0xff] %vm143_vm1, %v813_v24  ;;  %909 = vst.msk [vmem:[%s2137_s3 + $0x1c0] sm:$0xff] %vm143_vm1, %v845_v51  ;;  %v816_v22 = vadd.f32 %v752_v33, %v2180_v21  ;;  %v751_v15 = vadd.f32 %v536_v52, %v40_v9  ;;  %v783_v16 = vadd.f32 %v696_v55, %v72_v10 }
  0xfd   :  { %v848_v40 = vadd.f32 %v784_v34, %v2181_v39  ;;  %v1097_v56 = vpop.f32.mrf.mxu0  ;;  %v1145_v62 = vpop.f32.mrf.mxu1 }
  0xfe   :  { %880 = vst.msk [vmem:[%s2137_s3 + $0xd8] sm:$0xff] %vm143_vm1, %v816_v22  ;;  %v815_v38 = vadd.f32 %v751_v15, %v2182_v37  ;;  %v847_v28 = vadd.f32 %v783_v16, %v2183_v27  ;;  %v754_v57 = vadd.f32 %v1097_v56, %v43_v7  ;;  %v786_v58 = vadd.f32 %v1145_v62, %v75_v8 }
  0xff   :  { %912 = vst.msk [vmem:[%s2137_s3 + $0x1d8] sm:$0xff] %vm143_vm1, %v848_v40  ;;  %v546_v13 = vpop.f32.mrf.mxu0  ;;  %v706_v14 = vpop.f32.mrf.mxu1 }
 0x100   :  { %879 = vst.msk [vmem:[%s2137_s3 + $0xd0] sm:$0xff] %vm143_vm1, %v815_v38  ;;  %911 = vst.msk [vmem:[%s2137_s3 + $0x1d0] sm:$0xff] %vm143_vm1, %v847_v28  ;;  %v818_v6 = vadd.f32 %v754_v57, %v2184_v5  ;;  %v850_v26 = vadd.f32 %v786_v58, %v2185_v25  ;;  %v753_v3 = vadd.f32 %v546_v13, %v42_v63 }
 0x101   :  { %v785_v4 = vadd.f32 %v706_v14, %v74_v0  ;;  %v1100_v41 = vpop.f32.mrf.mxu0  ;;  %v1148_v42 = vpop.f32.mrf.mxu1 }
 0x102   :  { %882 = vst.msk [vmem:[%s2137_s3 + $0xe8] sm:$0xff] %vm143_vm1, %v818_v6  ;;  %914 = vst.msk [vmem:[%s2137_s3 + $0x1e8] sm:$0xff] %vm143_vm1, %v850_v26  ;;  %v817_v20 = vadd.f32 %v753_v3, %v2186_v19  ;;  %v756_v47 = vadd.f32 %v1100_v41, %v45_v43  ;;  %v788_v48 = vadd.f32 %v1148_v42, %v77_v44 }
 0x103   :  { %v849_v32 = vadd.f32 %v785_v4, %v2187_v31  ;;  %v556_v59 = vpop.f32.mrf.mxu0  ;;  %v716_v60 = vpop.f32.mrf.mxu1 }
 0x104   :  { %881 = vst.msk [vmem:[%s2137_s3 + $0xe0] sm:$0xff] %vm143_vm1, %v817_v20  ;;  %v820_v12 = vadd.f32 %v756_v47, %v2188_v11  ;;  %v852_v50 = vadd.f32 %v788_v48, %v2189_v61  ;;  %v755_v29 = vadd.f32 %v556_v59, %v44_v53  ;;  %v787_v30 = vadd.f32 %v716_v60, %v76_v54 }
 0x105   :  { %913 = vst.msk [vmem:[%s2137_s3 + $0x1e0] sm:$0xff] %vm143_vm1, %v849_v32 }
 0x106   :  { %884 = vst.msk [vmem:[%s2137_s3 + $0xf8] sm:$0xff] %vm143_vm1, %v820_v12  ;;  %916 = vst.msk [vmem:[%s2137_s3 + $0x1f8] sm:$0xff] %vm143_vm1, %v852_v50  ;;  %v819_v18 = vadd.f32 %v755_v29, %v2190_v17  ;;  %v851_v2 = vadd.f32 %v787_v30, %v2191_v1 }
 0x108   :  { %883 = vst.msk [vmem:[%s2137_s3 + $0xf0] sm:$0xff] %vm143_vm1, %v819_v18  ;;  %915 = vst.msk [vmem:[%s2137_s3 + $0x1f0] sm:$0xff] %vm143_vm1, %v851_v2 }

</bundles_post_ra>
